<compile_context>
chip_gen: v7x
topology: tpu7x:2x2x1
jax: 0.10.0
libtpu: 0.0.40
codegen_flags: <defaults>
</compile_context>

<pallas_src>
import jax
import jax.numpy as jnp
from jax.experimental import pallas as pl
from jax.experimental.pallas import tpu as pltpu


def _round_up(n, m):
    return ((n + m - 1) // m) * m


def joint_learn_kernel(x_ref, wc_ref, bc_ref, o_ref):
    # x tile streamed as f32; VPU cast to bf16 is free in this HBM-bound regime.
    x_bf = x_ref[...].astype(jnp.bfloat16)
    # single folded matmul: (tile_b, D_in) @ (D_in, D_out), f32 accumulate on the MXU
    y = jnp.dot(x_bf, wc_ref[...], preferred_element_type=jnp.float32)
    o_ref[...] = (y + bc_ref[...]).astype(o_ref.dtype)


def fold_params(w1, b1, w2, b2):
    """Fold fc1 and fc2 into one affine map (valid: no activation, dropout unused
    in forward). Call once per weight update -- NOT on every forward call."""
    wc_bf = jnp.dot(w1, w2).astype(jnp.bfloat16)            # (D_in, D_out)
    bc = (jnp.dot(b1, w2) + b2).astype(jnp.float32)         # (1, D_out), added post-accumulate
    return wc_bf, bc


def joint_learn_forward(x, wc_bf, bc, *, tile_b=4096):
    B, D_in = x.shape
    D_out = wc_bf.shape[1]

    # Very small batches: pallas_call fixed overhead dwarfs the work; let XLA do it.
    if B < 32:
        y = jnp.dot(x.astype(jnp.bfloat16), wc_bf,
                    preferred_element_type=jnp.float32) + bc
        return y.astype(x.dtype)

    # Tile selection: multiple of 8 (f32 sublane), clamped to batch. For large B make
    # sure the grid has >= 2 steps so the "parallel" axis can shard across the two
    # TensorCores on v7x (harmless on single-TC v5e/v6e).
    tb = min(tile_b, _round_up(B, 8))
    if B > 1024 and pl.cdiv(B, tb) < 2:
        tb = _round_up(pl.cdiv(B, 2), 8)
    grid = (pl.cdiv(B, tb),)  # ragged tail block handled by Pallas (no jnp.pad)

    cost = pl.CostEstimate(
        flops=2 * B * D_in * D_out,
        bytes_accessed=B * D_in * 4 + B * D_out * 4 + D_in * D_out * 2 + D_out * 4,
        transcendentals=0,
    )

    out = pl.pallas_call(
        joint_learn_kernel,
        out_shape=jax.ShapeDtypeStruct((B, D_out), x.dtype),
        grid_spec=pltpu.PrefetchScalarGridSpec(
            num_scalar_prefetch=0,
            grid=grid,
            in_specs=[
                pl.BlockSpec((tb, D_in), lambda i: (i, 0)),     # x tile (streamed, f32)
                pl.BlockSpec((D_in, D_out), lambda i: (0, 0)),  # folded weight (resident, ~5 KiB)
                pl.BlockSpec((1, D_out), lambda i: (0, 0)),     # folded bias (resident)
            ],
            out_specs=pl.BlockSpec((tb, D_out), lambda i: (i, 0)),
        ),
        compiler_params=pltpu.CompilerParams(
            dimension_semantics=("parallel",),
            vmem_limit_bytes=48 * 1024 * 1024,  # 2x f32 x tiles @ tb=4096 ~ 20 MiB; fits v7x's 64 MiB
        ),
        cost_estimate=cost,
    )(x, wc_bf, bc)

    return out


def init_params(key, input_dim=640, hidden=160, output_dim=4, dtype=jnp.float32):
    # Mimic PyTorch nn.Linear default init: U(-1/sqrt(fan_in), 1/sqrt(fan_in))
    k1, k2, k3, k4 = jax.random.split(key, 4)
    bound1 = 1.0 / jnp.sqrt(jnp.array(input_dim, dtype))
    bound2 = 1.0 / jnp.sqrt(jnp.array(hidden, dtype))
    w1 = jax.random.uniform(k1, (input_dim, hidden), dtype, -bound1, bound1)
    b1 = jax.random.uniform(k2, (1, hidden), dtype, -bound1, bound1)
    w2 = jax.random.uniform(k3, (hidden, output_dim), dtype, -bound2, bound2)
    b2 = jax.random.uniform(k4, (1, output_dim), dtype, -bound2, bound2)
    return w1, b1, w2, b2


if __name__ == "__main__":
    key = jax.random.PRNGKey(0)
    kx, kp = jax.random.split(key)

    # B chosen so the Pallas path is exercised; tile_b=256 in the demo gives a
    # multi-step grid with a ragged tail block (1000 % 256 != 0).
    B, INPUT_DIM, HIDDEN, OUTPUT_DIM = 1000, 640, 160, 4
    x = jax.random.normal(kx, (B, INPUT_DIM), jnp.float32)
    w1, b1, w2, b2 = init_params(kp, INPUT_DIM, HIDDEN, OUTPUT_DIM)

    # Fold once (outside the per-call path).
    wc_bf, bc = fold_params(w1, b1, w2, b2)

    out = joint_learn_forward(x, wc_bf, bc, tile_b=256)
    out = jax.block_until_ready(out)
    assert out.shape == (B, OUTPUT_DIM)

    # Tight check: same bf16-rounded inputs, f32 accumulation (matches kernel math).
    ref_bf16 = (x.astype(jnp.bfloat16).astype(jnp.float32)
                @ wc_bf.astype(jnp.float32)) + bc
    assert jnp.allclose(out, ref_bf16, atol=1e-3, rtol=1e-3)

    # Loose check vs the original two-layer f32 PyTorch semantics (bf16 rounding).
    ref_f32 = (x @ w1 + b1) @ w2 + b2
    assert jnp.allclose(out, ref_f32, atol=5e-2, rtol=5e-2)

    print("KERNEL_OK")
</pallas_src>

<mosaic_0001>
module attributes {stable_mosaic.version = 11 : i64} {
  func.func @joint_learn_kernel(%arg0: i32, %arg1: memref<256x640xf32, #tpu.memory_space<vmem>>, %arg2: memref<640x4xbf16, #tpu.memory_space<vmem>>, %arg3: memref<1x4xf32, #tpu.memory_space<vmem>>, %arg4: memref<256x4xf32, #tpu.memory_space<vmem>>) attributes {dimension_semantics = [#tpu.dimension_semantics<parallel>], iteration_bounds = array<i64: 4>, scalar_prefetch = 0 : i64, scratch_operands = 0 : i64, tpu.core_type = #tpu.core_type<tc>, window_params = [{transform_indices = @transform_0, window_bounds = array<i64: 256, 640>}, {pipeline_mode = #tpu.pipeline_mode<synchronous>, transform_indices = @transform_1, window_bounds = array<i64: 640, 4>}, {pipeline_mode = #tpu.pipeline_mode<synchronous>, transform_indices = @transform_2, window_bounds = array<i64: 1, 4>}, {transform_indices = @transform_3, window_bounds = array<i64: 256, 4>}]} {
    %c0 = arith.constant 0 : index
    %c0_0 = arith.constant 0 : index
    %0 = vector.load %arg1[%c0, %c0_0] : memref<256x640xf32, #tpu.memory_space<vmem>>, vector<256x640xf32>
    %1 = arith.truncf %0 : vector<256x640xf32> to vector<256x640xbf16>
    %c0_1 = arith.constant 0 : index
    %c0_2 = arith.constant 0 : index
    %2 = vector.load %arg2[%c0_1, %c0_2] : memref<640x4xbf16, #tpu.memory_space<vmem>>, vector<640x4xbf16>
    %cst = arith.constant dense<0.000000e+00> : vector<256x4xf32>
    %3 = tpu.matmul %1, %2, %cst {dimension_numbers = #tpu.dot_dimension_numbers<[1], [0], [0], [1], [0, 0, 1, 1], [], []>} : vector<256x640xbf16>, vector<640x4xbf16>, vector<256x4xf32> -> vector<256x4xf32>
    %c0_3 = arith.constant 0 : index
    %c0_4 = arith.constant 0 : index
    %4 = vector.load %arg3[%c0_3, %c0_4] : memref<1x4xf32, #tpu.memory_space<vmem>>, vector<1x4xf32>
    %5 = vector.broadcast %4 : vector<1x4xf32> to vector<256x4xf32>
    %6 = arith.addf %3, %5 : vector<256x4xf32>
    %c0_5 = arith.constant 0 : index
    %c0_6 = arith.constant 0 : index
    %7 = vector.load %arg4[%c0_5, %c0_6] : memref<256x4xf32, #tpu.memory_space<vmem>>, vector<256x4xf32>
    tpu.vector_store %arg4[%c0_5, %c0_6], %6 {strides = array<i32>} : memref<256x4xf32, #tpu.memory_space<vmem>>, vector<256x4xf32>,
    return
  }
  func.func @transform_0(%arg0: i32) -> (i32, i32) {
    %c0_i32 = arith.constant 0 : i32
    %c0_i32_0 = arith.constant 0 : i32
    return %arg0, %c0_i32 : i32, i32
  }
  func.func @transform_1(%arg0: i32) -> (i32, i32) {
    %c0_i32 = arith.constant 0 : i32
    %c0_i32_0 = arith.constant 0 : i32
    %c0_i32_1 = arith.constant 0 : i32
    return %c0_i32, %c0_i32_0 : i32, i32
  }
  func.func @transform_2(%arg0: i32) -> (i32, i32) {
    %c0_i32 = arith.constant 0 : i32
    %c0_i32_0 = arith.constant 0 : i32
    %c0_i32_1 = arith.constant 0 : i32
    return %c0_i32, %c0_i32_0 : i32, i32
  }
  func.func @transform_3(%arg0: i32) -> (i32, i32) {
    %c0_i32 = arith.constant 0 : i32
    %c0_i32_0 = arith.constant 0 : i32
    return %arg0, %c0_i32 : i32, i32
  }
}

</mosaic_0001>

<bundles_post_ra>
// kernel: tpu_custom_call.1
= control target key start
LH: loop header
LB: loop body
LE: loop exit
PB: predicated region body
PF: predicated region fallthrough
CT: control target
= control target key end

     0   :  { %8 = vsyncpa [#allocation3], 0  ;;  %s3152_s0 = inlined_call_operand.hbm [shape: f32[1000,640], index: 0, kind: input, shape index: {}]   ;;  %s3153_s1 = inlined_call_operand.vmem [shape: bf16[640,4], index: 1, kind: input, shape index: {}]   ;;  %s3154_s2 = inlined_call_operand.hbm [shape: f32[1,4], index: 2, kind: input, shape index: {}]   ;;  %s3155_s3 = inlined_call_operand.vmem [shape: f32[1000,4], index: 3, kind: output, shape index: {}]  }
   0x1   :  { %10 = vsyncpa [#allocation3 + $0x1], 0 }
   0x2   :  { %11 = vsyncpa [#allocation5], 0  ;;  %s2385_s12 = smov 0   ;;  %s2387_s13 = smov 0  }
   0x3   :  { %s2389_s14 = smov 0   ;;  %s2391_s15 = smov 0  }
   0x4 LB: > { %s2404_s16 = sadd.s32 4294967295, %s2327_s15   ;;  %s2407_s17 = sadd.s32 1, %s2327_s15   ;;  %s2327_s15 = sphi %s2391_s15, %s3178_s15   ;;  %s2323_s14 = sphi %s2389_s14, %s3177_s14   ;;  %s2319_s13 = sphi %s2387_s13, %s3176_s13   ;;  %s2315_s12 = sphi %s2385_s12, %s3175_s12  }
   0x5   : > { %s21_s18 = ssub.s32 %s2327_s15, %s2407_s17  ;;  %s24_s19 = sadd.s32 1, %s2323_s14 }
   0x6   : > { %p22_p0 = scmp.eq.s32.totalorder %s21_s18, 0  ;;  %p31_p1 = scmp.ne.s32.totalorder %s2323_s14, %s2319_s13 }
   0x7   : > { %p32_p2 = scmp.eq.s32.totalorder %s2327_s15, 0  ;;  %p37_p3 = scmp.ne.s32.totalorder %s2319_s13, %s2315_s12 }
   0x8   : > { %s2417_s20 = scalar_select %p22_p0, %s2323_s14, %s24_s19  }
   0x9   : > { %p2419_p4 = por %p32_p2, %p31_p1  ;;  %p3156_p5 = scmp.eq.s32.totalorder %s2404_s16, 0 }
   0xa   : > { %p103_p6 = scmp.eq.s32.totalorder %s2404_s16, 3  ;;  %p1662_p7 = scmp.ge.s32.totalorder %s2327_s15, 1 }
   0xb   : > { %s3159_s21 = scalar_select %p2419_p4, 1, 0 }
   0xc   : > { %p2428_p8 = por %p3156_p5, %p37_p3  ;;  %p116_p9 = scmp.lt.s32.totalorder %s2327_s15, 5 }
   0xd   : > { %p2433_p10 = por %p103_p6, %p31_p1  ;;  %s2361_s25 = smov [#allocation4]  }
   0xe   : > { %s3160_s22 = scalar_select %p2428_p8, 1, 0 }
   0xf   : > { %s3161_s23 = scalar_select %p2433_p10, 1, 0 }
  0x10   : > { %p2437_p11 = pnand %p1662_p7, %p116_p9  ;;  %s132_s26 = sshll.u32 %s2361_s25, 4  ;;  %s133_s26 = int_to_ptr.vmem [resolvable:$true] %s132_s26 }
  0x11   : > { %s2201_s30 = scalar_lea.hbm %s3154_s2, 16 }
  0x12   : > { %s3162_s24 = scalar_select %p2437_p11, 1, 0 }
  0x13   : > { %p2056_p12 = pneg %p2437_p11  ;;  %p2202_p0 = scmp.ne.s32.totalorder %s3154_s2, %s2201_s30 }
  0x14   : > { %p2208_p6 = scmp.lt.u32.totalorder %s2201_s30, %s3154_s2 }
  0x15   : > { %p2445_p13 = pnand %p2056_p12, %p3156_p5 }
  0x17   : > { %p2203_p1 = pneg %p2445_p13 }
  0x19   : > { %p2204_p2 = pnand %p2203_p1, %p2202_p0 }
  0x1b   : > { %p2205_p3 = pneg %p2204_p2 }
  0x1d   : > { %p2210_p7 = pnand %p2208_p6, %p2205_p3 }
  0x1f   : > { %2213 = shalt.err (!%p2210_p7)
}
  0x20   : > { %s2214_s8 = scalar_lea.vmem %s133_s26, 16  ;;  %s2221_s9 = scalar_lea.vmem %s133_s26, 32 }
  0x21   : > { %p2215_p9 = scmp.ne.s32.totalorder %s133_s26, %s2214_s8  ;;  %p2222_p10 = scmp.lt.s32.totalorder %s133_s26, %s133_s26 }
  0x22   : > { %p2223_p8 = scmp.lt.s32.totalorder %s2221_s9, %s2214_s8 }
  0x23   : > { %p2217_p12 = pnand %p2215_p9, %p2203_p1 }
  0x24   : > { %p2224_p11 = por %p2223_p8, %p2222_p10 }
  0x25   : > { %p2218_p5 = pneg %p2217_p12 }
  0x27   : > { %p2225_p4 = pnand %p2224_p11, %p2218_p5 }
  0x29   : > { %2228 = shalt.err (!%p2225_p4)
}
  0x2a   : > { %2059 = dma.hbm_to_vmem [thread:$0]  (!%p2445_p13), %s3154_s2, 16, %s133_s26, [#allocation5]  }
  0x2b   : > { %p1664_p0 = scmp.ge.s32.totalorder %s2327_s15, 4 }
  0x2c   : > { %p3164_p2 = scmp.ne.s32.totalorder (!%p1664_p0), %s3159_s21, 0 }
  0x2d   : > { %139 = sbr.rel (%p1664_p0) target bundleno = 88 (0x58), region = 24 }
  0x34   : > { %142 = sbr.rel (!%p3164_p2) target bundleno = 88 (0x58), region = 28  ;;  %s143_s12 = sand.u32 (%p3164_p2), 1, %s2323_s14  }
  0x35   : > { %s1665_s18 = sshll.u32 (%p3164_p2), %s2327_s15, 5  ;;  %s2048_s19 = smul.u32 (%p3164_p2), 1280, %s143_s12 }
  0x36   : > { %s149_s25 = ssub.s32 (%p3164_p2), 125, %s1665_s18  ;;  %s2473_s29 = scalar_lea.sflag (%p3164_p2), [#allocation3], %s143_s12 }
  0x37   : > { %p150_p5 = scmp.lt.s32.totalorder (%p3164_p2), %s149_s25, 32  ;;  %s147_s26 = scalar_lea.vmem (%p3164_p2), [#allocation2], %s2048_s19 }
  0x3b   : > { %s3180_s25 = smov (!%p150_p5, %s149_s25), 32 }
  0x3c   : > { %s2470_s28 = smul.u32 640, %s3180_s25 }
  0x3e   : > { %s155_s27 = ssub.s32 20480, %s2470_s28 }
  0x3f   : > { %156 = vsyncadd %s2473_s29, %s155_s27  ;;  %p1668_p4 = scmp.ne.s32.totalorder %s2470_s28, 0  ;;  %s2049_s21 = smul.u32 20480, %s2327_s15 }
  0x40   : > { %s162_s30 = sshll.u32 %s147_s26, 4  ;;  %s2233_s15 = scalar_lea.hbm %s3152_s0, 80000  ;;  %s2483_s30 = int_to_ptr.vmem [resolvable:$true] %s162_s30 }
  0x41   : > { %s2481_s6 = scalar_lea.hbm %s3152_s0, %s2049_s21 }
  0x42   : > { %s2229_s7 = scalar_lea.hbm %s2481_s6, %s2470_s28  ;;  %p2234_p13 = scmp.lt.u32.totalorder %s2481_s6, %s3152_s0 }
  0x43   : > { %p2230_p8 = scmp.ne.s32.totalorder %s2481_s6, %s2229_s7  ;;  %p2235_p1 = scmp.lt.u32.totalorder %s2233_s15, %s2229_s7 }
  0x44   : > { %p2237_p6 = scmp.lt.u32.totalorder %s2229_s7, %s2481_s6 }
  0x45   : > { %p2231_p10 = pnand %p2230_p8, %p1668_p4  ;;  %p2236_p3 = por %p2235_p1, %p2234_p13 }
  0x47   : > { %p2232_p11 = pneg %p2231_p10  ;;  %p2238_p7 = por %p2237_p6, %p2236_p3 }
  0x49   : > { %p2239_p9 = pnand %p2238_p7, %p2232_p11 }
  0x4b   : > { %2242 = shalt.err (!%p2239_p9)
}
  0x4c   : > { %s2243_s12 = scalar_lea.vmem %s2483_s30, %s2470_s28  ;;  %s2362_s18 = smov [#allocation2]  }
  0x4d   : > { %p2244_p12 = scmp.ne.s32.totalorder %s2483_s30, %s2243_s12  ;;  %s2247_s19 = sshll.u32 %s2362_s18, 4  ;;  %s2248_s19 = int_to_ptr.vmem [resolvable:$false] %s2247_s19 }
  0x4e   : > { %s2249_s25 = scalar_lea.vmem %s2248_s19, 40960  ;;  %p2250_p5 = scmp.lt.s32.totalorder %s2483_s30, %s2248_s19 }
  0x4f   : > { %p2245_p0 = pnand %p2244_p12, %p1668_p4  ;;  %p2251_p8 = scmp.lt.s32.totalorder %s2249_s25, %s2243_s12 }
  0x51   : > { %p2246_p2 = pneg %p2245_p0  ;;  %p2252_p10 = por %p2251_p8, %p2250_p5 }
  0x53   : > { %p2253_p13 = pnand %p2252_p10, %p2246_p2 }
  0x55   : > { %2256 = shalt.err (!%p2253_p13)
}
  0x56   : > { %s2363_s27 = smov 640   ;;  %s2364_s26 = smov 40  }
  0x57   : > { %168 = dma.hbm_to_vmem [thread:$0]  (%p1668_p4), %s2481_s6, %s2470_s28, %s2483_s30, %s2473_s29, %s2363_s27, %s2363_s27, %s2364_s26  }
  0x58 PF: > { %p3165_p11 = scmp.ne.s32.totalorder %s3162_s24, 0 }
  0x59   : > { %s2513_s21 = sand.u32 (!%p3165_p11), 1, %s2319_s13   ;;  %p3166_p1 = scmp.ne.s32.totalorder (!%p3165_p11), %s3160_s22, 0 }
  0x5a   : > { %174 = sbr.rel (%p3165_p11) target bundleno = 564 (0x234), region = 32  ;;  %s177_s5 = scalar_lea.sflag (!%p3165_p11), [#allocation3], %s2513_s21 }
  0x5b   : > { %s2050_s4 = smul.u32 (!%p3165_p11), 1280, %s2513_s21 }
  0x5d   : > { %s2517_s7 = scalar_lea.vmem (!%p3165_p11), [#allocation2], %s2050_s4 }
  0x61   : > { %2306 = dma.done.wait (%p3166_p1), %s177_s5, 20480  }
  0x62   : > { %2308 = vsyncadd (%p3166_p1), %s177_s5, 4294946816  ;;  %p3167_p4 = scmp.eq.s32.totalorder %s2404_s16, 0 }
  0x64   : > { %2310 = dma.done.wait (%p3167_p4), [#allocation5], 16   ;;  %p3168_p3 = pmov %p3167_p4 }
  0x65   : > { %v2161_v0 = vld [vmem:[%s3153_s1 + $0x40] sm:$0xff]   ;;  %v2163_v2 = vld [vmem:[%s3153_s1 + $0x48] sm:$0xff]   ;;  %v2165_v4 = vld [vmem:[%s3153_s1 + $0x50] sm:$0xff]   ;;  %vm1268_vm0 = vcmask 31744   ;;  %p3169_p6 = scmp.ne.s32.totalorder %s3161_s23, 0 }
  0x66   : > { %2312 = vsyncadd (%p3168_p3), [#allocation5], 4294967280  ;;  %v2162_v1 = vld [vmem:[%s3153_s1] sm:$0xff]   ;;  %1736 = vmatprep.subr.bf16.mxu0 %v2161_v0  ;;  %2032 = vmatprep.subr.bf16.mxu1 %v2161_v0  ;;  %v2164_v3 = vld [vmem:[%s3153_s1 + $0x8] sm:$0xff]   ;;  %s1733_s8 = sshll.u32 (%p3169_p6), %s2404_s16, 8 }
  0x67   : > { %1737 = vmatpush3.bf16.msra.mxu0 %v2162_v1  ;;  %2040 = vmatpush3.bf16.msra.mxu1 %v2162_v1  ;;  %v2166_v5 = vld [vmem:[%s3153_s1 + $0x10] sm:$0xff]   ;;  %v2167_v6 = vld [vmem:[%s3153_s1 + $0x58] sm:$0xff]   ;;  %v2169_v8 = vld [vmem:[%s3153_s1 + $0x60] sm:$0xff]   ;;  %s3017_s10 = scalar_lea.vmem (%p3169_p6), %s3155_s3, %s1733_s8  }
  0x68   : > { %1738 = vmatprep.subr.bf16.mxu0 %v2163_v2  ;;  %2033 = vmatprep.subr.bf16.mxu1 %v2163_v2  ;;  %v2168_v7 = vld [vmem:[%s3153_s1 + $0x18] sm:$0xff]   ;;  %v2170_v9 = vld [vmem:[%s3153_s1 + $0x20] sm:$0xff]   ;;  %v2171_v10 = vld [vmem:[%s3153_s1 + $0x68] sm:$0xff]  }
  0x69   : > { %v219_v11 = vld [vmem:[%s2517_s7 + $0x8] sm:$0xff]  ;;  %v224_v12 = vld [vmem:[%s2517_s7 + $0x30] sm:$0xff]  ;;  %v2175_v20 = vld [vmem:[%s3153_s1 + $0x78] sm:$0xff]  }
  0x6a   : > { %v339_v13 = vld [vmem:[%s2517_s7 + $0x3c8] sm:$0xff]  ;;  %v379_v14 = vpack.c.bf16 %v224_v12, %v219_v11  ;;  %v344_v15 = vld [vmem:[%s2517_s7 + $0x3f0] sm:$0xff]  ;;  %v2176_v21 = vld [vmem:[%s3153_s1 + $0x38] sm:$0xff]  }
  0x6b   : > { %1739 = vmatpush3.bf16.msra.mxu0 %v2164_v3  ;;  %2041 = vmatpush3.bf16.msra.mxu1 %v2164_v3  ;;  %v439_v16 = vpack.c.bf16 %v344_v15, %v339_v13  ;;  %v2172_v17 = vld [vmem:[%s3153_s1 + $0x28] sm:$0xff]   ;;  %v2173_v18 = vld [vmem:[%s3153_s1 + $0x70] sm:$0xff]   ;;  %v218_v22 = vld [vmem:[%s2517_s7] sm:$0xff] }
  0x6c   : > { %1740 = vmatprep.subr.bf16.mxu0 %v2165_v4  ;;  %2034 = vmatprep.subr.bf16.mxu1 %v2165_v4  ;;  %v2174_v19 = vld [vmem:[%s3153_s1 + $0x30] sm:$0xff]   ;;  %v223_v23 = vld [vmem:[%s2517_s7 + $0x28] sm:$0xff]  ;;  %v338_v24 = vld [vmem:[%s2517_s7 + $0x3c0] sm:$0xff] }
  0x6d   : > { %817 = vmatprep.mubr.bf16.mxu0 %v379_v14  ;;  %913 = vmatprep.mubr.bf16.mxu1 %v439_v16  ;;  %v343_v25 = vld [vmem:[%s2517_s7 + $0x3e8] sm:$0xff]  ;;  %v2177_v26 = vld [vmem:[%s3153_s1 + $0xc0] sm:$0xff]   ;;  %v229_v28 = vld [vmem:[%s2517_s7 + $0x58] sm:$0xff]  ;;  %v378_v30 = vpack.c.bf16 %v223_v23, %v218_v22 }
  0x6e   : > { %v2180_v27 = vld [vmem:[%s3153_s1 + $0x100] sm:$0xff]   ;;  %v438_v31 = vpack.c.bf16 %v343_v25, %v338_v24  ;;  %v349_v32 = vld [vmem:[%s2517_s7 + $0x418] sm:$0xff]  ;;  %v2179_v35 = vld [vmem:[%s3153_s1 + $0xc8] sm:$0xff]  }
  0x6f   : > { %1741 = vmatpush3.bf16.msra.mxu0 %v2166_v5  ;;  %2042 = vmatpush3.bf16.msra.mxu1 %v2166_v5  ;;  %v234_v29 = vld [vmem:[%s2517_s7 + $0x80] sm:$0xff]  ;;  %v2181_v37 = vld [vmem:[%s3153_s1 + $0x88] sm:$0xff]   ;;  %v228_v39 = vld [vmem:[%s2517_s7 + $0x50] sm:$0xff] }
  0x70   : > { %1742 = vmatprep.subr.bf16.mxu0 %v2167_v6  ;;  %2035 = vmatprep.subr.bf16.mxu1 %v2167_v6  ;;  %v354_v33 = vld [vmem:[%s2517_s7 + $0x440] sm:$0xff]  ;;  %v384_v36 = vpack.c.bf16 %v234_v29, %v229_v28  ;;  %v233_v40 = vld [vmem:[%s2517_s7 + $0x78] sm:$0xff]  ;;  %v348_v41 = vld [vmem:[%s2517_s7 + $0x410] sm:$0xff] }
  0x71   : > { %v2178_v34 = vld [vmem:[%s3153_s1 + $0x80] sm:$0xff]   ;;  %v444_v38 = vpack.c.bf16 %v354_v33, %v349_v32  ;;  %v353_v42 = vld [vmem:[%s2517_s7 + $0x438] sm:$0xff]  ;;  %v2182_v43 = vld [vmem:[%s3153_s1 + $0xd0] sm:$0xff]   ;;  %v383_v49 = vpack.c.bf16 %v233_v40, %v228_v39 }
  0x72   : > { %v239_v44 = vld [vmem:[%s2517_s7 + $0xa8] sm:$0xff]  ;;  %v244_v46 = vld [vmem:[%s2517_s7 + $0xd0] sm:$0xff]  ;;  %v443_v50 = vpack.c.bf16 %v353_v42, %v348_v41  ;;  %v2184_v53 = vld [vmem:[%s3153_s1 + $0xd8] sm:$0xff]  }
  0x73   : > { %1743 = vmatpush3.bf16.msra.mxu0 %v2168_v7  ;;  %2043 = vmatpush3.bf16.msra.mxu1 %v2168_v7  ;;  %v2187_v45 = vld [vmem:[%s3153_s1 + $0x108] sm:$0xff]   ;;  %v364_v48 = vld [vmem:[%s2517_s7 + $0x490] sm:$0xff]  ;;  %v389_v52 = vpack.c.bf16 %v244_v46, %v239_v44  ;;  %v2185_v55 = vld [vmem:[%s3153_s1 + $0x98] sm:$0xff]  }
  0x74   : > { %1744 = vmatprep.subr.bf16.mxu0 %v2169_v8  ;;  %2036 = vmatprep.subr.bf16.mxu1 %v2169_v8  ;;  %v359_v47 = vld [vmem:[%s2517_s7 + $0x468] sm:$0xff]  ;;  %v2183_v51 = vld [vmem:[%s3153_s1 + $0x90] sm:$0xff]   ;;  %v238_v56 = vld [vmem:[%s2517_s7 + $0xa0] sm:$0xff] }
  0x75   : > { %v449_v54 = vpack.c.bf16 %v364_v48, %v359_v47  ;;  %v243_v57 = vld [vmem:[%s2517_s7 + $0xc8] sm:$0xff]  ;;  %v358_v58 = vld [vmem:[%s2517_s7 + $0x460] sm:$0xff]  ;;  %v249_v61 = vld [vmem:[%s2517_s7 + $0xf8] sm:$0xff] }
  0x76   : > { %v363_v59 = vld [vmem:[%s2517_s7 + $0x488] sm:$0xff]  ;;  %v2186_v60 = vld [vmem:[%s3153_s1 + $0xe0] sm:$0xff]   ;;  %v2194_v63 = vld [vmem:[%s3153_s1 + $0x110] sm:$0xff]   ;;  %v388_v2 = vpack.c.bf16 %v243_v57, %v238_v56 }
  0x77   : > { %1745 = vmatpush3.bf16.msra.mxu0 %v2170_v9  ;;  %2044 = vmatpush3.bf16.msra.mxu1 %v2170_v9  ;;  %v254_v62 = vld [vmem:[%s2517_s7 + $0x120] sm:$0xff]  ;;  %v369_v0 = vld [vmem:[%s2517_s7 + $0x4b8] sm:$0xff]  ;;  %v448_v3 = vpack.c.bf16 %v363_v59, %v358_v58  ;;  %v2189_v6 = vld [vmem:[%s3153_s1 + $0xe8] sm:$0xff]  }
  0x78   : > { %1746 = vmatprep.subr.bf16.mxu0 %v2171_v10  ;;  %2037 = vmatprep.subr.bf16.mxu1 %v2171_v10  ;;  %v374_v1 = vld [vmem:[%s2517_s7 + $0x4e0] sm:$0xff]  ;;  %v394_v5 = vpack.c.bf16 %v254_v62, %v249_v61  ;;  %v2190_v8 = vld [vmem:[%s3153_s1 + $0xa8] sm:$0xff]   ;;  %v248_v9 = vld [vmem:[%s2517_s7 + $0xf0] sm:$0xff] }
  0x79   : > { %v2188_v4 = vld [vmem:[%s3153_s1 + $0xa0] sm:$0xff]   ;;  %v454_v7 = vpack.c.bf16 %v374_v1, %v369_v0  ;;  %v253_v10 = vld [vmem:[%s2517_s7 + $0x118] sm:$0xff]  ;;  %v368_v11 = vld [vmem:[%s2517_s7 + $0x4b0] sm:$0xff] }
  0x7a   : > { %v373_v12 = vld [vmem:[%s2517_s7 + $0x4d8] sm:$0xff]  ;;  %v2191_v14 = vld [vmem:[%s3153_s1 + $0xf0] sm:$0xff]   ;;  %v259_v15 = vld [vmem:[%s2517_s7 + $0x148] sm:$0xff] }
  0x7b   : > { %1747 = vmatpush3.bf16.msra.mxu0 %v2172_v17  ;;  %2045 = vmatpush3.bf16.msra.mxu1 %v2172_v17  ;;  %v2196_v13 = vld [vmem:[%s3153_s1 + $0x118] sm:$0xff]   ;;  %v264_v16 = vld [vmem:[%s2517_s7 + $0x170] sm:$0xff]  ;;  %v2197_v23 = vld [vmem:[%s3153_s1 + $0x120] sm:$0xff]  }
  0x7c   : > { %1748 = vmatprep.subr.bf16.mxu0 %v2173_v18  ;;  %2038 = vmatprep.subr.bf16.mxu1 %v2173_v18  ;;  %v221_v17 = vld [vmem:[%s2517_s7 + $0x18] sm:$0xff]  ;;  %v226_v18 = vld [vmem:[%s2517_s7 + $0x40] sm:$0xff]  ;;  %v399_v22 = vpack.c.bf16 %v264_v16, %v259_v15  ;;  %v263_v28 = vld [vmem:[%s2517_s7 + $0x168] sm:$0xff] }
  0x7d   : > { %v2193_v24 = vld [vmem:[%s3153_s1 + $0xf8] sm:$0xff]   ;;  %v381_v25 = vpack.c.bf16 %v226_v18, %v221_v17  ;;  %v220_v29 = vld [vmem:[%s2517_s7 + $0x10] sm:$0xff]  ;;  %v274_v32 = vld [vmem:[%s2517_s7 + $0x1c0] sm:$0xff] }
  0x7e   : > { %v231_v33 = vld [vmem:[%s2517_s7 + $0x68] sm:$0xff]  ;;  %v2199_v40 = vld [vmem:[%s3153_s1 + $0x130] sm:$0xff]   ;;  %v273_v42 = vld [vmem:[%s2517_s7 + $0x1b8] sm:$0xff] }
  0x7f   : > { %1749 = vmatpush3.bf16.msra.mxu0 %v2174_v19  ;;  %2046 = vmatpush3.bf16.msra.mxu1 %v2174_v19  ;;  %v393_v19 = vpack.c.bf16 %v253_v10, %v248_v9  ;;  %v268_v41 = vld [vmem:[%s2517_s7 + $0x190] sm:$0xff]  ;;  %v235_v44 = vld [vmem:[%s2517_s7 + $0x88] sm:$0xff]  ;;  %v241_v47 = vld [vmem:[%s2517_s7 + $0xb8] sm:$0xff] }
  0x80   : > { %1750 = vmatprep.subr.bf16.mxu0 %v2175_v20  ;;  %2039 = vmatprep.subr.bf16.mxu1 %v2175_v20  ;;  %v453_v20 = vpack.c.bf16 %v373_v12, %v368_v11  ;;  %v284_v46 = vld [vmem:[%s2517_s7 + $0x210] sm:$0xff]  ;;  %v246_v48 = vld [vmem:[%s2517_s7 + $0xe0] sm:$0xff]  ;;  %v245_v57 = vld [vmem:[%s2517_s7 + $0xd8] sm:$0xff] }
  0x81   : > { %v240_v56 = vld [vmem:[%s2517_s7 + $0xb0] sm:$0xff]  ;;  %v289_v58 = vld [vmem:[%s2517_s7 + $0x238] sm:$0xff]  ;;  %v294_v59 = vld [vmem:[%s2517_s7 + $0x260] sm:$0xff] }
  0x82   : > { %v256_v61 = vld [vmem:[%s2517_s7 + $0x130] sm:$0xff]  ;;  %v414_v0 = vpack.c.bf16 %v294_v59, %v289_v58  ;;  %v266_v9 = vld [vmem:[%s2517_s7 + $0x180] sm:$0xff]  ;;  %v303_v15 = vld [vmem:[%s2517_s7 + $0x2a8] sm:$0xff] }
  0x83   : > { %1751 = vmatpush3.bf16.msra.mxu0 %v2176_v21  ;;  %2047 = vmatpush3.bf16.msra.mxu1 %v2176_v21  ;;  %v2192_v21 = vld [vmem:[%s3153_s1 + $0xb0] sm:$0xff]   ;;  %v265_v17 = vld [vmem:[%s2517_s7 + $0x178] sm:$0xff] }
  0x84   : > { %1848 = vmatprep.subr.bf16.mxu1 %v2177_v26  ;;  %1984 = vmatprep.subr.bf16.mxu0 %v2180_v27  ;;  %v2195_v26 = vld [vmem:[%s3153_s1 + $0xb8] sm:$0xff]   ;;  %v260_v16 = vld [vmem:[%s2517_s7 + $0x150] sm:$0xff] }
  0x85   : > { %v309_v18 = vld [vmem:[%s2517_s7 + $0x2d8] sm:$0xff] }
  0x86   : > { %818 = vmatmul.mubr.bf16.vlgmr.msra.gmra.mrb[0].mxu0 %v378_v30  ;;  %914 = vmatmul.mubr.bf16.vlgmr.msra.gmra.mrb[0].mxu1 %v438_v31  ;;  %v225_v30 = vld [vmem:[%s2517_s7 + $0x38] sm:$0xff] }
  0x87   : > { %1849 = vmatpush3.bf16.msra.mxu1 %v2178_v34  ;;  %1985 = vmatpush3.bf16.msra.mxu0 %v2180_v27  ;;  %v258_v27 = vld [vmem:[%s2517_s7 + $0x140] sm:$0xff]  ;;  %v269_v31 = vld [vmem:[%s2517_s7 + $0x198] sm:$0xff]  ;;  %v236_v34 = vld [vmem:[%s2517_s7 + $0x90] sm:$0xff] }
  0x88   : > { %1850 = vmatprep.subr.bf16.mxu1 %v2179_v35  ;;  %825 = vmatprep.mubr.bf16.mxu0 %v384_v36  ;;  %v2198_v35 = vld [vmem:[%s3153_s1 + $0x128] sm:$0xff]   ;;  %v398_v36 = vpack.c.bf16 %v263_v28, %v258_v27  ;;  %v386_v39 = vpack.c.bf16 %v236_v34, %v231_v33  ;;  %v313_v27 = vld [vmem:[%s2517_s7 + $0x2f8] sm:$0xff]  ;;  %v270_v28 = vld [vmem:[%s2517_s7 + $0x1a0] sm:$0xff] }
  0x89   : > { %921 = vmatprep.mubr.bf16.mxu1 %v444_v38  ;;  %1986 = vmatprep.subr.bf16.mxu0 %v2187_v45  ;;  %v404_v38 = vpack.c.bf16 %v274_v32, %v269_v31  ;;  %v324_v31 = vld [vmem:[%s2517_s7 + $0x350] sm:$0xff]  ;;  %v281_v32 = vld [vmem:[%s2517_s7 + $0x1f8] sm:$0xff]  ;;  %v286_v33 = vld [vmem:[%s2517_s7 + $0x220] sm:$0xff] }
  0x8b   : > { %1851 = vmatpush3.bf16.msra.mxu1 %v2181_v37  ;;  %1987 = vmatpush3.bf16.msra.mxu0 %v2187_v45  ;;  %v380_v37 = vpack.c.bf16 %v225_v30, %v220_v29  ;;  %v279_v45 = vld [vmem:[%s2517_s7 + $0x1e8] sm:$0xff] }
  0x8c   : > { %1852 = vmatprep.subr.bf16.mxu1 %v2182_v43  ;;  %1988 = vmatprep.subr.bf16.mxu0 %v2194_v63  ;;  %v230_v43 = vld [vmem:[%s2517_s7 + $0x60] sm:$0xff]  ;;  %v275_v29 = vld [vmem:[%s2517_s7 + $0x1c8] sm:$0xff] }
  0x8d   : > { %v319_v30 = vld [vmem:[%s2517_s7 + $0x328] sm:$0xff] }
  0x8e   : > { %826 = vmatmul.mubr.bf16.gmra.mrb[4].mxu0 %v383_v49  ;;  %922 = vmatmul.mubr.bf16.gmra.mrb[4].mxu1 %v443_v50  ;;  %v403_v49 = vpack.c.bf16 %v273_v42, %v268_v41  ;;  %v385_v50 = vpack.c.bf16 %v235_v44, %v230_v43  ;;  %v285_v41 = vld [vmem:[%s2517_s7 + $0x218] sm:$0xff]  ;;  %v334_v43 = vld [vmem:[%s2517_s7 + $0x3a0] sm:$0xff]  ;;  %v291_v44 = vld [vmem:[%s2517_s7 + $0x248] sm:$0xff] }
  0x8f   : > { %1853 = vmatpush3.bf16.msra.mxu1 %v2183_v51  ;;  %833 = vmatprep.mubr.bf16.mxu0 %v389_v52  ;;  %v409_v51 = vpack.c.bf16 %v284_v46, %v279_v45  ;;  %v391_v52 = vpack.c.bf16 %v246_v48, %v241_v47  ;;  %v329_v42 = vld [vmem:[%s2517_s7 + $0x378] sm:$0xff]  ;;  %v296_v45 = vld [vmem:[%s2517_s7 + $0x270] sm:$0xff] }
  0x90   : > { %1854 = vmatprep.subr.bf16.mxu1 %v2184_v53  ;;  %929 = vmatprep.mubr.bf16.mxu1 %v449_v54  ;;  %v2200_v53 = vld [vmem:[%s3153_s1 + $0x138] sm:$0xff]   ;;  %v278_v54 = vld [vmem:[%s2517_s7 + $0x1e0] sm:$0xff]  ;;  %v434_v48 = vpack.c.bf16 %v334_v43, %v329_v42 }
  0x91   : > { %1989 = vmatpush3.bf16.msra.mxu0 %v2194_v63  ;;  %v390_v63 = vpack.c.bf16 %v245_v57, %v240_v56  ;;  %v222_v56 = vld [vmem:[%s2517_s7 + $0x20] sm:$0xff]  ;;  %v227_v57 = vld [vmem:[%s2517_s7 + $0x48] sm:$0xff] }
  0x92   : > { %1990 = vmatprep.subr.bf16.mxu0 %v2196_v13 }
  0x93   : > { %1855 = vmatpush3.bf16.msra.mxu1 %v2185_v55  ;;  %v283_v55 = vld [vmem:[%s2517_s7 + $0x208] sm:$0xff] }
  0x94   : > { %1856 = vmatprep.subr.bf16.mxu1 %v2186_v60  ;;  %v251_v60 = vld [vmem:[%s2517_s7 + $0x108] sm:$0xff]  ;;  %v408_v62 = vpack.c.bf16 %v283_v55, %v278_v54  ;;  %v301_v54 = vld [vmem:[%s2517_s7 + $0x298] sm:$0xff]  ;;  %v306_v55 = vld [vmem:[%s2517_s7 + $0x2c0] sm:$0xff] }
  0x95   : > { %1991 = vmatpush3.bf16.msra.mxu0 %v2196_v13  ;;  %v396_v1 = vpack.c.bf16 %v256_v61, %v251_v60  ;;  %v421_v60 = vpack.c.bf16 %v306_v55, %v301_v54  ;;  %v382_v61 = vpack.c.bf16 %v227_v57, %v222_v56 }
  0x96   : > { %834 = vmatmul.mubr.bf16.gmra.mrb[8].mxu0 %v388_v2  ;;  %930 = vmatmul.mubr.bf16.gmra.mrb[8].mxu1 %v448_v3  ;;  %v288_v2 = vld [vmem:[%s2517_s7 + $0x230] sm:$0xff]  ;;  %v293_v3 = vld [vmem:[%s2517_s7 + $0x258] sm:$0xff] }
  0x97   : > { %1857 = vmatpush3.bf16.msra.mxu1 %v2188_v4  ;;  %841 = vmatprep.mubr.bf16.mxu0 %v394_v5  ;;  %v250_v4 = vld [vmem:[%s2517_s7 + $0x100] sm:$0xff]  ;;  %v255_v5 = vld [vmem:[%s2517_s7 + $0x128] sm:$0xff]  ;;  %v413_v10 = vpack.c.bf16 %v293_v3, %v288_v2  ;;  %v316_v3 = vld [vmem:[%s2517_s7 + $0x310] sm:$0xff] }
  0x98   : > { %1858 = vmatprep.subr.bf16.mxu1 %v2189_v6  ;;  %937 = vmatprep.mubr.bf16.mxu1 %v454_v7  ;;  %v299_v6 = vld [vmem:[%s2517_s7 + $0x288] sm:$0xff]  ;;  %v304_v7 = vld [vmem:[%s2517_s7 + $0x2b0] sm:$0xff]  ;;  %v395_v11 = vpack.c.bf16 %v255_v5, %v250_v4  ;;  %v242_v4 = vld [vmem:[%s2517_s7 + $0xc0] sm:$0xff] }
  0x99   : > { %1992 = vmatprep.subr.bf16.mxu0 %v2197_v23  ;;  %v419_v12 = vpack.c.bf16 %v304_v7, %v299_v6  ;;  %v311_v2 = vld [vmem:[%s2517_s7 + $0x2e8] sm:$0xff] }
  0x9a   : > { %1993 = vmatpush3.bf16.msra.mxu0 %v2197_v23  ;;  %v400_v23 = vpack.c.bf16 %v265_v17, %v260_v16  ;;  %v247_v5 = vld [vmem:[%s2517_s7 + $0xe8] sm:$0xff]  ;;  %v262_v16 = vld [vmem:[%s2517_s7 + $0x160] sm:$0xff] }
  0x9b   : > { %1859 = vmatpush3.bf16.msra.mxu1 %v2190_v8  ;;  %1994 = vmatprep.subr.bf16.mxu0 %v2198_v35  ;;  %v261_v8 = vld [vmem:[%s2517_s7 + $0x158] sm:$0xff]  ;;  %v267_v17 = vld [vmem:[%s2517_s7 + $0x188] sm:$0xff] }
  0x9c   : > { %1860 = vmatprep.subr.bf16.mxu1 %v2191_v14  ;;  %v401_v13 = vpack.c.bf16 %v266_v9, %v261_v8  ;;  %v298_v14 = vld [vmem:[%s2517_s7 + $0x280] sm:$0xff]  ;;  %v426_v8 = vpack.c.bf16 %v316_v3, %v311_v2  ;;  %v392_v9 = vpack.c.bf16 %v247_v5, %v242_v4 }
  0x9e   : > { %842 = vmatmul.mubr.bf16.gmra.mrb[12].mxu0 %v393_v19  ;;  %938 = vmatmul.mubr.bf16.gmra.mrb[12].mxu1 %v453_v20  ;;  %v314_v19 = vld [vmem:[%s2517_s7 + $0x300] sm:$0xff]  ;;  %v271_v20 = vld [vmem:[%s2517_s7 + $0x1a8] sm:$0xff] }
  0x9f   : > { %1861 = vmatpush3.bf16.msra.mxu1 %v2192_v21  ;;  %849 = vmatprep.mubr.bf16.mxu0 %v399_v22  ;;  %v276_v21 = vld [vmem:[%s2517_s7 + $0x1d0] sm:$0xff]  ;;  %v418_v22 = vpack.c.bf16 %v303_v15, %v298_v14  ;;  %v321_v14 = vld [vmem:[%s2517_s7 + $0x338] sm:$0xff]  ;;  %v326_v15 = vld [vmem:[%s2517_s7 + $0x360] sm:$0xff] }
  0xa0   : > { %1862 = vmatprep.subr.bf16.mxu1 %v2193_v24  ;;  %978 = vmatprep.mubr.bf16.mxu1 %v381_v25  ;;  %v424_v24 = vpack.c.bf16 %v314_v19, %v309_v18  ;;  %v406_v25 = vpack.c.bf16 %v276_v21, %v271_v20  ;;  %v431_v20 = vpack.c.bf16 %v326_v15, %v321_v14 }
  0xa1   : > { %1995 = vmatpush3.bf16.msra.mxu0 %v2198_v35  ;;  %v405_v35 = vpack.c.bf16 %v275_v29, %v270_v28  ;;  %v402_v21 = vpack.c.bf16 %v267_v17, %v262_v16  ;;  %v282_v28 = vld [vmem:[%s2517_s7 + $0x200] sm:$0xff]  ;;  %v287_v29 = vld [vmem:[%s2517_s7 + $0x228] sm:$0xff] }
  0xa2   : > { %1996 = vmatprep.subr.bf16.mxu0 %v2199_v40 }
  0xa3   : > { %1863 = vmatpush3.bf16.msra.mxu1 %v2195_v26  ;;  %v308_v26 = vld [vmem:[%s2517_s7 + $0x2d0] sm:$0xff] }
  0xa4   : > { %v423_v34 = vpack.c.bf16 %v313_v27, %v308_v26  ;;  %v331_v26 = vld [vmem:[%s2517_s7 + $0x388] sm:$0xff]  ;;  %v336_v27 = vld [vmem:[%s2517_s7 + $0x3b0] sm:$0xff] }
  0xa5   : > { %1997 = vmatpush3.bf16.msra.mxu0 %v2199_v40  ;;  %v280_v40 = vld [vmem:[%s2517_s7 + $0x1f0] sm:$0xff] }
  0xa6   : > { %850 = vmatmul.mubr.bf16.gmra.mrb[16].mxu0 %v398_v36  ;;  %979 = vmatmul.mubr.bf16.vlgmr.msra.gmra.mrb[16].mxu1 %v380_v37  ;;  %v429_v36 = vpack.c.bf16 %v324_v31, %v319_v30  ;;  %v411_v37 = vpack.c.bf16 %v286_v33, %v281_v32  ;;  %v410_v47 = vpack.c.bf16 %v285_v41, %v280_v40  ;;  %v302_v40 = vld [vmem:[%s2517_s7 + $0x2a0] sm:$0xff]  ;;  %v307_v41 = vld [vmem:[%s2517_s7 + $0x2c8] sm:$0xff] }
  0xa7   : > { %857 = vmatprep.mubr.bf16.mxu0 %v404_v38  ;;  %986 = vmatprep.mubr.bf16.mxu1 %v386_v39  ;;  %v318_v38 = vld [vmem:[%s2517_s7 + $0x320] sm:$0xff]  ;;  %v323_v39 = vld [vmem:[%s2517_s7 + $0x348] sm:$0xff]  ;;  %v436_v32 = vpack.c.bf16 %v336_v27, %v331_v26  ;;  %v412_v33 = vpack.c.bf16 %v287_v29, %v282_v28 }
  0xa8   : > { %1998 = vmatprep.subr.bf16.mxu0 %v2200_v53  ;;  %v428_v46 = vpack.c.bf16 %v323_v39, %v318_v38  ;;  %v341_v38 = vld [vmem:[%s2517_s7 + $0x3d8] sm:$0xff]  ;;  %v346_v39 = vld [vmem:[%s2517_s7 + $0x400] sm:$0xff] }
  0xa9   : > { %1999 = vmatpush3.bf16.msra.mxu0 %v2200_v53  ;;  %v295_v53 = vld [vmem:[%s2517_s7 + $0x268] sm:$0xff] }
  0xae   : > { %858 = vmatmul.mubr.bf16.gmra.mrb[20].mxu0 %v403_v49  ;;  %987 = vmatmul.mubr.bf16.gmra.mrb[20].mxu1 %v385_v50  ;;  %v416_v49 = vpack.c.bf16 %v296_v45, %v291_v44  ;;  %v328_v50 = vld [vmem:[%s2517_s7 + $0x370] sm:$0xff]  ;;  %v441_v44 = vpack.c.bf16 %v346_v39, %v341_v38  ;;  %v422_v45 = vpack.c.bf16 %v307_v41, %v302_v40 }
  0xaf   : > { %865 = vmatprep.mubr.bf16.mxu0 %v409_v51  ;;  %994 = vmatprep.mubr.bf16.mxu1 %v391_v52  ;;  %v333_v51 = vld [vmem:[%s2517_s7 + $0x398] sm:$0xff]  ;;  %v290_v52 = vld [vmem:[%s2517_s7 + $0x240] sm:$0xff] }
  0xb0   : > { %v433_v58 = vpack.c.bf16 %v333_v51, %v328_v50  ;;  %v415_v59 = vpack.c.bf16 %v295_v53, %v290_v52  ;;  %v351_v50 = vld [vmem:[%s2517_s7 + $0x428] sm:$0xff]  ;;  %v356_v51 = vld [vmem:[%s2517_s7 + $0x450] sm:$0xff]  ;;  %v322_v52 = vld [vmem:[%s2517_s7 + $0x340] sm:$0xff] }
  0xb1   : > { %v327_v53 = vld [vmem:[%s2517_s7 + $0x368] sm:$0xff]  ;;  %v446_v56 = vpack.c.bf16 %v356_v51, %v351_v50 }
  0xb2   : > { %v432_v57 = vpack.c.bf16 %v327_v53, %v322_v52 }
  0xb6   : > { %866 = vmatmul.mubr.bf16.gmra.mrb[24].mxu0 %v408_v62  ;;  %995 = vmatmul.mubr.bf16.gmra.mrb[24].mxu1 %v390_v63  ;;  %v300_v62 = vld [vmem:[%s2517_s7 + $0x290] sm:$0xff]  ;;  %v305_v63 = vld [vmem:[%s2517_s7 + $0x2b8] sm:$0xff] }
  0xb7   : > { %873 = vmatprep.mubr.bf16.mxu0 %v414_v0  ;;  %1002 = vmatprep.mubr.bf16.mxu1 %v396_v1  ;;  %v232_v0 = vld [vmem:[%s2517_s7 + $0x70] sm:$0xff]  ;;  %v237_v1 = vld [vmem:[%s2517_s7 + $0x98] sm:$0xff]  ;;  %v420_v6 = vpack.c.bf16 %v305_v63, %v300_v62  ;;  %v366_v63 = vld [vmem:[%s2517_s7 + $0x4a0] sm:$0xff] }
  0xb8   : > { %v387_v7 = vpack.c.bf16 %v237_v1, %v232_v0  ;;  %v361_v62 = vld [vmem:[%s2517_s7 + $0x478] sm:$0xff]  ;;  %v342_v0 = vld [vmem:[%s2517_s7 + $0x3e0] sm:$0xff]  ;;  %v347_v1 = vld [vmem:[%s2517_s7 + $0x408] sm:$0xff] }
  0xb9   : > { %v451_v4 = vpack.c.bf16 %v366_v63, %v361_v62  ;;  %v442_v5 = vpack.c.bf16 %v347_v1, %v342_v0 }
  0xbe   : > { %874 = vmatmul.mubr.bf16.gmra.mrb[28].mxu0 %v413_v10  ;;  %1003 = vmatmul.mubr.bf16.gmra.mrb[28].mxu1 %v395_v11  ;;  %v310_v10 = vld [vmem:[%s2517_s7 + $0x2e0] sm:$0xff]  ;;  %v315_v11 = vld [vmem:[%s2517_s7 + $0x308] sm:$0xff] }
  0xbf   : > { %881 = vmatprep.mubr.bf16.mxu0 %v419_v12  ;;  %1010 = vmatprep.mubr.bf16.mxu1 %v401_v13  ;;  %v252_v12 = vld [vmem:[%s2517_s7 + $0x110] sm:$0xff]  ;;  %v257_v13 = vld [vmem:[%s2517_s7 + $0x138] sm:$0xff]  ;;  %v425_v18 = vpack.c.bf16 %v315_v11, %v310_v10  ;;  %v371_v10 = vld [vmem:[%s2517_s7 + $0x4c8] sm:$0xff] }
  0xc0   : > { %v397_v19 = vpack.c.bf16 %v257_v13, %v252_v12  ;;  %v376_v11 = vld [vmem:[%s2517_s7 + $0x4f0] sm:$0xff]  ;;  %v362_v12 = vld [vmem:[%s2517_s7 + $0x480] sm:$0xff]  ;;  %v367_v13 = vld [vmem:[%s2517_s7 + $0x4a8] sm:$0xff] }
  0xc1   : > { %v456_v16 = vpack.c.bf16 %v376_v11, %v371_v10  ;;  %v452_v17 = vpack.c.bf16 %v367_v13, %v362_v12  ;;  %v2823_v10 = vld [vmem:[#allocation4] ss:$0 sm:$0xff] }
  0xc6   : > { %882 = vmatmul.mubr.bf16.gmra.mrb[32].mxu0 %v418_v22  ;;  %1011 = vmatmul.mubr.bf16.gmra.mrb[32].mxu1 %v400_v23  ;;  %v320_v22 = vld [vmem:[%s2517_s7 + $0x330] sm:$0xff]  ;;  %v325_v23 = vld [vmem:[%s2517_s7 + $0x358] sm:$0xff] }
  0xc7   : > { %889 = vmatprep.mubr.bf16.mxu0 %v424_v24  ;;  %1018 = vmatprep.mubr.bf16.mxu1 %v406_v25  ;;  %v272_v24 = vld [vmem:[%s2517_s7 + $0x1b0] sm:$0xff]  ;;  %v277_v25 = vld [vmem:[%s2517_s7 + $0x1d8] sm:$0xff]  ;;  %v430_v30 = vpack.c.bf16 %v325_v23, %v320_v22 }
  0xc8   : > { %v407_v31 = vpack.c.bf16 %v277_v25, %v272_v24 }
  0xce   : > { %890 = vmatmul.mubr.bf16.gmra.mrb[36].mxu0 %v423_v34  ;;  %1019 = vmatmul.mubr.bf16.gmra.mrb[36].mxu1 %v405_v35  ;;  %v330_v34 = vld [vmem:[%s2517_s7 + $0x380] sm:$0xff]  ;;  %v335_v35 = vld [vmem:[%s2517_s7 + $0x3a8] sm:$0xff] }
  0xcf   : > { %897 = vmatprep.mubr.bf16.mxu0 %v429_v36  ;;  %1026 = vmatprep.mubr.bf16.mxu1 %v411_v37  ;;  %v292_v36 = vld [vmem:[%s2517_s7 + $0x250] sm:$0xff]  ;;  %v297_v37 = vld [vmem:[%s2517_s7 + $0x278] sm:$0xff]  ;;  %v435_v42 = vpack.c.bf16 %v335_v35, %v330_v34 }
  0xd0   : > { %v417_v43 = vpack.c.bf16 %v297_v37, %v292_v36 }
  0xd6   : > { %898 = vmatmul.mubr.bf16.gmra.mrb[40].mxu0 %v428_v46  ;;  %1027 = vmatmul.mubr.bf16.gmra.mrb[40].mxu1 %v410_v47  ;;  %v340_v46 = vld [vmem:[%s2517_s7 + $0x3d0] sm:$0xff]  ;;  %v345_v47 = vld [vmem:[%s2517_s7 + $0x3f8] sm:$0xff] }
  0xd7   : > { %905 = vmatprep.mubr.bf16.mxu0 %v434_v48  ;;  %1034 = vmatprep.mubr.bf16.mxu1 %v416_v49  ;;  %v312_v48 = vld [vmem:[%s2517_s7 + $0x2f0] sm:$0xff]  ;;  %v317_v49 = vld [vmem:[%s2517_s7 + $0x318] sm:$0xff]  ;;  %v440_v54 = vpack.c.bf16 %v345_v47, %v340_v46 }
  0xd8   : > { %v427_v55 = vpack.c.bf16 %v317_v49, %v312_v48 }
  0xde   : > { %906 = vmatmul.mubr.bf16.gmra.mrb[44].mxu0 %v433_v58  ;;  %1035 = vmatmul.mubr.bf16.gmra.mrb[44].mxu1 %v415_v59  ;;  %v350_v58 = vld [vmem:[%s2517_s7 + $0x420] sm:$0xff]  ;;  %v355_v59 = vld [vmem:[%s2517_s7 + $0x448] sm:$0xff] }
  0xdf   : > { %1042 = vmatprep.mubr.bf16.mxu1 %v421_v60  ;;  %2000 = vmatprep.mubr.bf16.mxu0 %v382_v61  ;;  %v332_v60 = vld [vmem:[%s2517_s7 + $0x390] sm:$0xff]  ;;  %v337_v61 = vld [vmem:[%s2517_s7 + $0x3b8] sm:$0xff]  ;;  %v445_v2 = vpack.c.bf16 %v355_v59, %v350_v58 }
  0xe0   : > { %v437_v3 = vpack.c.bf16 %v337_v61, %v332_v60 }
  0xe6   : > { %1043 = vmatmul.mubr.bf16.gmra.mrb[48].mxu1 %v420_v6  ;;  %2001 = vmatmul.mubr.bf16.vlgmr.msra.gmra.mrb[48].mxu0 %v387_v7  ;;  %v360_v6 = vld [vmem:[%s2517_s7 + $0x470] sm:$0xff]  ;;  %v365_v7 = vld [vmem:[%s2517_s7 + $0x498] sm:$0xff] }
  0xe7   : > { %1050 = vmatprep.mubr.bf16.mxu1 %v426_v8  ;;  %2004 = vmatprep.mubr.bf16.mxu0 %v392_v9  ;;  %v352_v8 = vld [vmem:[%s2517_s7 + $0x430] sm:$0xff]  ;;  %v357_v9 = vld [vmem:[%s2517_s7 + $0x458] sm:$0xff]  ;;  %v450_v14 = vpack.c.bf16 %v365_v7, %v360_v6 }
  0xe8   : > { %v447_v15 = vpack.c.bf16 %v357_v9, %v352_v8 }
  0xee   : > { %1051 = vmatmul.mubr.bf16.gmra.mrb[52].mxu1 %v425_v18  ;;  %2005 = vmatmul.mubr.bf16.gmra.mrb[52].mxu0 %v397_v19  ;;  %v370_v18 = vld [vmem:[%s2517_s7 + $0x4c0] sm:$0xff]  ;;  %v375_v19 = vld [vmem:[%s2517_s7 + $0x4e8] sm:$0xff] }
  0xef   : > { %1058 = vmatprep.mubr.bf16.mxu1 %v431_v20  ;;  %2008 = vmatprep.mubr.bf16.mxu0 %v402_v21  ;;  %v372_v20 = vld [vmem:[%s2517_s7 + $0x4d0] sm:$0xff]  ;;  %v377_v21 = vld [vmem:[%s2517_s7 + $0x4f8] sm:$0xff]  ;;  %v455_v22 = vpack.c.bf16 %v375_v19, %v370_v18  ;;  %s1674_s7 = sshll.u32 %s2513_s21, 8  ;;  %s1717_s21 = sshll.u32 (%p3169_p6), %s2404_s16, 5 }
  0xf0   : > { %v457_v23 = vpack.c.bf16 %v377_v21, %v372_v20  ;;  %s2894_s6 = scalar_lea.vmem [#allocation6], %s1674_s7   ;;  %s1309_s22 = ssub.s32 (%p3169_p6), 125, %s1717_s21 }
  0xf1   : > { %p1310_p7 = scmp.lt.s32.totalorder (%p3169_p6), %s1309_s22, 32 }
  0xf6   : > { %1059 = vmatmul.mubr.bf16.gmra.mrb[56].mxu1 %v430_v30  ;;  %2009 = vmatmul.mubr.bf16.gmra.mrb[56].mxu0 %v407_v31 }
  0xf7   : > { %1066 = vmatprep.mubr.bf16.mxu1 %v436_v32  ;;  %2012 = vmatprep.mubr.bf16.mxu0 %v412_v33 }
  0xfe   : > { %1067 = vmatmul.mubr.bf16.gmra.mrb[60].mxu1 %v435_v42  ;;  %2013 = vmatmul.mubr.bf16.gmra.mrb[60].mxu0 %v417_v43 }
  0xff   : > { %1074 = vmatprep.mubr.bf16.mxu1 %v441_v44  ;;  %2016 = vmatprep.mubr.bf16.mxu0 %v422_v45 }
 0x106   : > { %1075 = vmatmul.mubr.bf16.gmra.mrb[64].mxu1 %v440_v54  ;;  %2017 = vmatmul.mubr.bf16.gmra.mrb[64].mxu0 %v427_v55 }
 0x107   : > { %1082 = vmatprep.mubr.bf16.mxu1 %v446_v56  ;;  %2020 = vmatprep.mubr.bf16.mxu0 %v432_v57 }
 0x10e   : > { %1083 = vmatmul.mubr.bf16.gmra.mrb[68].mxu1 %v445_v2  ;;  %2021 = vmatmul.mubr.bf16.gmra.mrb[68].mxu0 %v437_v3 }
 0x10f   : > { %1090 = vmatprep.mubr.bf16.mxu1 %v451_v4  ;;  %2024 = vmatprep.mubr.bf16.mxu0 %v442_v5 }
 0x116   : > { %1091 = vmatmul.mubr.bf16.gmra.mrb[72].mxu1 %v450_v14  ;;  %2025 = vmatmul.mubr.bf16.gmra.mrb[72].mxu0 %v447_v15 }
 0x117   : > { %1098 = vmatprep.mubr.bf16.mxu1 %v456_v16  ;;  %2028 = vmatprep.mubr.bf16.mxu0 %v452_v17 }
 0x11e   : > { %1099 = vmatmul.mubr.bf16.gmra.mrb[76].mxu1 %v455_v22  ;;  %2029 = vmatmul.mubr.bf16.gmra.mrb[76].mxu0 %v457_v23 }
 0x159   : > { %v1824_v24 = vpop.f32.mrb[0].mxu1  ;;  %v1752_v25 = vpop.f32.mrb[0].mxu0 }
 0x15a   : > { %v1825_v26 = vpop.f32.mrb[1].mxu1  ;;  %v1753_v27 = vpop.f32.mrb[1].mxu0 }
 0x15b   : > { %v2807_v28 = vadd.f32 %v1825_v26, %v1824_v24  ;;  %v1827_v29 = vpop.f32.mrb[2].mxu1  ;;  %v1754_v30 = vadd.f32 %v1753_v27, %v1752_v25  ;;  %v1755_v31 = vpop.f32.mrb[2].mxu0 }
 0x15c   : > { %v1828_v32 = vpop.f32.mrb[3].mxu1  ;;  %v1756_v33 = vpop.f32.mrb[3].mxu0 }
 0x15d   : > { %v2809_v34 = vadd.f32 %v1828_v32, %v1827_v29  ;;  %v1757_v35 = vadd.f32 %v1756_v33, %v1755_v31  ;;  %v820_v13 = vadd.f32 %v1754_v30, %v2823_v10 }
 0x15f   : > { %v823_v20 = vadd.f32 %v1757_v35, %v2823_v10 }
 0x161   : > { %v1830_v36 = vpop.f32.mrb[4].mxu1  ;;  %v1758_v37 = vpop.f32.mrb[4].mxu0 }
 0x162   : > { %v1831_v38 = vpop.f32.mrb[5].mxu1  ;;  %v1759_v39 = vpop.f32.mrb[5].mxu0 }
 0x163   : > { %v2811_v40 = vadd.f32 %v1831_v38, %v1830_v36  ;;  %v1833_v41 = vpop.f32.mrb[6].mxu1  ;;  %v1760_v42 = vadd.f32 %v1759_v39, %v1758_v37  ;;  %v1761_v43 = vpop.f32.mrb[6].mxu0 }
 0x164   : > { %v1834_v44 = vpop.f32.mrb[7].mxu1  ;;  %v1762_v45 = vpop.f32.mrb[7].mxu0 }
 0x165   : > { %v2813_v46 = vadd.f32 %v1834_v44, %v1833_v41  ;;  %v1763_v47 = vadd.f32 %v1762_v45, %v1761_v43  ;;  %v828_v30 = vadd.f32 %v1760_v42, %v2823_v10 }
 0x167   : > { %v831_v35 = vadd.f32 %v1763_v47, %v2823_v10 }
 0x169   : > { %v1836_v48 = vpop.f32.mrb[8].mxu1  ;;  %v1764_v49 = vpop.f32.mrb[8].mxu0 }
 0x16a   : > { %v1837_v50 = vpop.f32.mrb[9].mxu1  ;;  %v1765_v51 = vpop.f32.mrb[9].mxu0 }
 0x16b   : > { %v2815_v52 = vadd.f32 %v1837_v50, %v1836_v48  ;;  %v1839_v53 = vpop.f32.mrb[10].mxu1  ;;  %v1766_v54 = vadd.f32 %v1765_v51, %v1764_v49  ;;  %v1767_v55 = vpop.f32.mrb[10].mxu0 }
 0x16c   : > { %v1840_v56 = vpop.f32.mrb[11].mxu1  ;;  %v1768_v57 = vpop.f32.mrb[11].mxu0 }
 0x16d   : > { %v2817_v58 = vadd.f32 %v1840_v56, %v1839_v53  ;;  %v1769_v59 = vadd.f32 %v1768_v57, %v1767_v55  ;;  %v836_v42 = vadd.f32 %v1766_v54, %v2823_v10 }
 0x16f   : > { %v839_v47 = vadd.f32 %v1769_v59, %v2823_v10 }
 0x171   : > { %v1842_v60 = vpop.f32.mrb[12].mxu1  ;;  %v1770_v61 = vpop.f32.mrb[12].mxu0 }
 0x172   : > { %v1843_v62 = vpop.f32.mrb[13].mxu1  ;;  %v1771_v63 = vpop.f32.mrb[13].mxu0 }
 0x173   : > { %v2819_v0 = vadd.f32 %v1843_v62, %v1842_v60  ;;  %v1845_v1 = vpop.f32.mrb[14].mxu1  ;;  %v1772_v2 = vadd.f32 %v1771_v63, %v1770_v61  ;;  %v1773_v3 = vpop.f32.mrb[14].mxu0 }
 0x174   : > { %v1846_v4 = vpop.f32.mrb[15].mxu1  ;;  %v1774_v5 = vpop.f32.mrb[15].mxu0 }
 0x175   : > { %v2821_v6 = vadd.f32 %v1846_v4, %v1845_v1  ;;  %v1775_v7 = vadd.f32 %v1774_v5, %v1773_v3  ;;  %v844_v54 = vadd.f32 %v1772_v2, %v2823_v10 }
 0x177   : > { %v847_v59 = vadd.f32 %v1775_v7, %v2823_v10 }
 0x179   : > { %v1864_v8 = vpop.f32.mrb[16].mxu1  ;;  %v1776_v9 = vpop.f32.mrb[16].mxu0 }
 0x17a   : > { %v1865_v11 = vpop.f32.mrb[17].mxu1  ;;  %v1777_v12 = vpop.f32.mrb[17].mxu0 }
 0x17b   : > { %v1866_v14 = vadd.f32 %v1865_v11, %v1864_v8  ;;  %v1867_v15 = vpop.f32.mrb[18].mxu1  ;;  %v1778_v16 = vadd.f32 %v1777_v12, %v1776_v9  ;;  %v1779_v17 = vpop.f32.mrb[18].mxu0 }
 0x17c   : > { %v1868_v18 = vpop.f32.mrb[19].mxu1  ;;  %v1780_v19 = vpop.f32.mrb[19].mxu0 }
 0x17d   : > { %v1869_v21 = vadd.f32 %v1868_v18, %v1867_v15  ;;  %v1781_v22 = vadd.f32 %v1780_v19, %v1779_v17  ;;  %v2827_v23 = vadd.f32 %v1866_v14, %v820_v13  ;;  %v852_v2 = vadd.f32 %v1778_v16, %v2823_v10 }
 0x17f   : > { %v2829_v24 = vadd.f32 %v1869_v21, %v823_v20  ;;  %v855_v7 = vadd.f32 %v1781_v22, %v2823_v10 }
 0x181   : > { %v1870_v25 = vpop.f32.mrb[20].mxu1  ;;  %v1782_v26 = vpop.f32.mrb[20].mxu0 }
 0x182   : > { %v1871_v27 = vpop.f32.mrb[21].mxu1  ;;  %v1783_v29 = vpop.f32.mrb[21].mxu0 }
 0x183   : > { %v1872_v31 = vadd.f32 %v1871_v27, %v1870_v25  ;;  %v1873_v32 = vpop.f32.mrb[22].mxu1  ;;  %v1784_v33 = vadd.f32 %v1783_v29, %v1782_v26  ;;  %v1785_v36 = vpop.f32.mrb[22].mxu0 }
 0x184   : > { %v1874_v37 = vpop.f32.mrb[23].mxu1  ;;  %v1786_v38 = vpop.f32.mrb[23].mxu0 }
 0x185   : > { %v1875_v39 = vadd.f32 %v1874_v37, %v1873_v32  ;;  %v1787_v41 = vadd.f32 %v1786_v38, %v1785_v36  ;;  %v2833_v43 = vadd.f32 %v1872_v31, %v828_v30 }
 0x187   : > { %v2835_v44 = vadd.f32 %v1875_v39, %v831_v35 }
 0x189   : > { %v1876_v45 = vpop.f32.mrb[24].mxu1  ;;  %v1788_v48 = vpop.f32.mrb[24].mxu0 }
 0x18a   : > { %v1877_v49 = vpop.f32.mrb[25].mxu1  ;;  %v1789_v50 = vpop.f32.mrb[25].mxu0 }
 0x18b   : > { %v1878_v51 = vadd.f32 %v1877_v49, %v1876_v45  ;;  %v1879_v53 = vpop.f32.mrb[26].mxu1  ;;  %v1790_v55 = vadd.f32 %v1789_v50, %v1788_v48  ;;  %v1791_v56 = vpop.f32.mrb[26].mxu0 }
 0x18c   : > { %v1880_v57 = vpop.f32.mrb[27].mxu1  ;;  %v1792_v60 = vpop.f32.mrb[27].mxu0 }
 0x18d   : > { %v1881_v61 = vadd.f32 %v1880_v57, %v1879_v53  ;;  %v1793_v62 = vadd.f32 %v1792_v60, %v1791_v56  ;;  %v2839_v63 = vadd.f32 %v1878_v51, %v836_v42  ;;  %v860_v42 = vadd.f32 %v1784_v33, %v2823_v10 }
 0x18f   : > { %v2841_v1 = vadd.f32 %v1881_v61, %v839_v47  ;;  %v863_v47 = vadd.f32 %v1787_v41, %v2823_v10 }
 0x191   : > { %v1882_v3 = vpop.f32.mrb[28].mxu1  ;;  %v1794_v4 = vpop.f32.mrb[28].mxu0 }
 0x192   : > { %v1883_v5 = vpop.f32.mrb[29].mxu1  ;;  %v1795_v8 = vpop.f32.mrb[29].mxu0 }
 0x193   : > { %v1884_v9 = vadd.f32 %v1883_v5, %v1882_v3  ;;  %v1885_v11 = vpop.f32.mrb[30].mxu1  ;;  %v1796_v12 = vadd.f32 %v1795_v8, %v1794_v4  ;;  %v1797_v13 = vpop.f32.mrb[30].mxu0 }
 0x194   : > { %v1886_v14 = vpop.f32.mrb[31].mxu1  ;;  %v1798_v15 = vpop.f32.mrb[31].mxu0 }
 0x195   : > { %v1887_v17 = vadd.f32 %v1886_v14, %v1885_v11  ;;  %v1799_v18 = vadd.f32 %v1798_v15, %v1797_v13  ;;  %v2845_v19 = vadd.f32 %v1884_v9, %v844_v54  ;;  %v868_v11 = vadd.f32 %v1790_v55, %v2823_v10 }
 0x197   : > { %v2847_v20 = vadd.f32 %v1887_v17, %v847_v59 }
 0x199   : > { %v1888_v21 = vpop.f32.mrb[32].mxu1  ;;  %v1800_v25 = vpop.f32.mrb[32].mxu0 }
 0x19a   : > { %v1889_v26 = vpop.f32.mrb[33].mxu1  ;;  %v1801_v27 = vpop.f32.mrb[33].mxu0 }
 0x19b   : > { %v1890_v29 = vadd.f32 %v1889_v26, %v1888_v21  ;;  %v1891_v30 = vpop.f32.mrb[34].mxu1  ;;  %v2850_v31 = vadd.f32 %v1801_v27, %v1800_v25  ;;  %v1803_v32 = vpop.f32.mrb[34].mxu0  ;;  %v871_v21 = vadd.f32 %v1793_v62, %v2823_v10 }
 0x19c   : > { %v1892_v36 = vpop.f32.mrb[35].mxu1  ;;  %v1804_v37 = vpop.f32.mrb[35].mxu0 }
 0x19d   : > { %v1893_v38 = vadd.f32 %v1892_v36, %v1891_v30  ;;  %v2853_v35 = vadd.f32 %v1804_v37, %v1803_v32  ;;  %v2855_v39 = vadd.f32 %v1890_v29, %v852_v2  ;;  %v876_v36 = vadd.f32 %v1796_v12, %v2823_v10 }
 0x19f   : > { %v2857_v45 = vadd.f32 %v1893_v38, %v855_v7 }
 0x1a1   : > { %v1894_v48 = vpop.f32.mrb[36].mxu1  ;;  %v1806_v49 = vpop.f32.mrb[36].mxu0 }
 0x1a2   : > { %v1895_v50 = vpop.f32.mrb[37].mxu1  ;;  %v1807_v16 = vpop.f32.mrb[37].mxu0 }
 0x1a3   : > { %v1896_v51 = vadd.f32 %v1895_v50, %v1894_v48  ;;  %v1897_v53 = vpop.f32.mrb[38].mxu1  ;;  %v2860_v56 = vadd.f32 %v1807_v16, %v1806_v49  ;;  %v1809_v57 = vpop.f32.mrb[38].mxu0  ;;  %v879_v50 = vadd.f32 %v1799_v18, %v2823_v10 }
 0x1a4   : > { %v1898_v60 = vpop.f32.mrb[39].mxu1  ;;  %v1810_v22 = vpop.f32.mrb[39].mxu0 }
 0x1a5   : > { %v1899_v61 = vadd.f32 %v1898_v60, %v1897_v53  ;;  %v2863_v3 = vadd.f32 %v1810_v22, %v1809_v57  ;;  %v2865_v4 = vadd.f32 %v1896_v51, %v860_v42 }
 0x1a7   : > { %v2867_v5 = vadd.f32 %v1899_v61, %v863_v47  ;;  %v884_v61 = vadd.f32 %v2850_v31, %v2823_v10  ;;  %v887_v31 = vadd.f32 %v2853_v35, %v2823_v10 }
 0x1a9   : > { %v1900_v8 = vpop.f32.mrb[40].mxu1  ;;  %v1812_v54 = vpop.f32.mrb[40].mxu0 }
 0x1aa   : > { %v1901_v9 = vpop.f32.mrb[41].mxu1  ;;  %v1813_v33 = vpop.f32.mrb[41].mxu0 }
 0x1ab   : > { %v1902_v13 = vadd.f32 %v1901_v9, %v1900_v8  ;;  %v1903_v14 = vpop.f32.mrb[42].mxu1  ;;  %v2870_v15 = vadd.f32 %v1813_v33, %v1812_v54  ;;  %v1815_v59 = vpop.f32.mrb[42].mxu0 }
 0x1ac   : > { %v1904_v17 = vpop.f32.mrb[43].mxu1  ;;  %v1816_v41 = vpop.f32.mrb[43].mxu0 }
 0x1ad   : > { %v1905_v25 = vadd.f32 %v1904_v17, %v1903_v14  ;;  %v2873_v26 = vadd.f32 %v1816_v41, %v1815_v59  ;;  %v2875_v27 = vadd.f32 %v1902_v13, %v868_v11 }
 0x1af   : > { %v2877_v2 = vadd.f32 %v1905_v25, %v871_v21 }
 0x1b1   : > { %v1906_v29 = vpop.f32.mrb[44].mxu1  ;;  %v1818_v30 = vpop.f32.mrb[44].mxu0 }
 0x1b2   : > { %v1907_v55 = vpop.f32.mrb[45].mxu1  ;;  %v1819_v32 = vpop.f32.mrb[45].mxu0 }
 0x1b3   : > { %v1908_v37 = vadd.f32 %v1907_v55, %v1906_v29  ;;  %v1909_v7 = vpop.f32.mrb[46].mxu1  ;;  %v2880_v38 = vadd.f32 %v1819_v32, %v1818_v30  ;;  %v1821_v48 = vpop.f32.mrb[46].mxu0 }
 0x1b4   : > { %v1910_v62 = vpop.f32.mrb[47].mxu1  ;;  %v1822_v49 = vpop.f32.mrb[47].mxu0 }
 0x1b5   : > { %v1911_v16 = vadd.f32 %v1910_v62, %v1909_v7  ;;  %v2883_v42 = vadd.f32 %v1822_v49, %v1821_v48  ;;  %v2885_v51 = vadd.f32 %v1908_v37, %v876_v36 }
 0x1b7   : > { %v2888_v53 = vadd.f32 %v1911_v16, %v879_v50  ;;  %v900_v16 = vadd.f32 %v2870_v15, %v2823_v10 }
 0x1b9   : > { %v1912_v57 = vpop.f32.mrb[48].mxu1  ;;  %v2002_v60 = vpop.f32.mrb[48].mxu0 }
 0x1ba   : > { %v1150_v12 = vadd.f32 %v2002_v60, %v2833_v43  ;;  %v1913_v22 = vpop.f32.mrb[49].mxu1  ;;  %v1141_v47 = vpop.f32.mrb[49].mxu0 }
 0x1bb   : > { %v1914_v8 = vadd.f32 %v1913_v22, %v1912_v57  ;;  %v1142_v18 = vadd.f32 %v1141_v47, %v2827_v23  ;;  %v1915_v54 = vpop.f32.mrb[50].mxu1  ;;  %v2003_v9 = vpop.f32.mrb[50].mxu0 }
 0x1bc   : > { %1271 = vst.msk [vmem:[%s2894_s6 + $0x10] sm:$0xff] %vm1268_vm0, %v1150_v12  ;;  %v1153_v43 = vadd.f32 %v2003_v9, %v2835_v44  ;;  %v1916_v33 = vpop.f32.mrb[51].mxu1  ;;  %v1144_v11 = vpop.f32.mrb[51].mxu0 }
 0x1bd   : > { %1269 = vst.msk [vmem:[%s2894_s6] sm:$0xff] %vm1268_vm0, %v1142_v18  ;;  %v1917_v23 = vadd.f32 %v1916_v33, %v1915_v54  ;;  %v1145_v13 = vadd.f32 %v1144_v11, %v2829_v24  ;;  %v2904_v14 = vadd.f32 %v1914_v8, %v884_v61  ;;  %v892_v24 = vadd.f32 %v2860_v56, %v2823_v10 }
 0x1be   : > { %1272 = vst.msk [vmem:[%s2894_s6 + $0x18] sm:$0xff] %vm1268_vm0, %v1153_v43  ;;  %v908_v33 = vadd.f32 %v2880_v38, %v2823_v10 }
 0x1bf   : > { %1270 = vst.msk [vmem:[%s2894_s6 + $0x8] sm:$0xff] %vm1268_vm0, %v1145_v13  ;;  %v2910_v59 = vadd.f32 %v1917_v23, %v887_v31 }
 0x1c1   : > { %v1918_v44 = vpop.f32.mrb[52].mxu1  ;;  %v2006_v17 = vpop.f32.mrb[52].mxu0 }
 0x1c2   : > { %v1166_v41 = vadd.f32 %v2006_v17, %v2845_v19  ;;  %v1919_v35 = vpop.f32.mrb[53].mxu1  ;;  %v1157_v21 = vpop.f32.mrb[53].mxu0  ;;  %v895_v19 = vadd.f32 %v2863_v3, %v2823_v10 }
 0x1c3   : > { %v1920_v25 = vadd.f32 %v1919_v35, %v1918_v44  ;;  %v1158_v29 = vadd.f32 %v1157_v21, %v2839_v63  ;;  %v1921_v30 = vpop.f32.mrb[54].mxu1  ;;  %v2007_v55 = vpop.f32.mrb[54].mxu0 }
 0x1c4   : > { %1275 = vst.msk [vmem:[%s2894_s6 + $0x30] sm:$0xff] %vm1268_vm0, %v1166_v41  ;;  %v1169_v32 = vadd.f32 %v2007_v55, %v2847_v20  ;;  %v1922_v36 = vpop.f32.mrb[55].mxu1  ;;  %v1160_v37 = vpop.f32.mrb[55].mxu0 }
 0x1c5   : > { %1273 = vst.msk [vmem:[%s2894_s6 + $0x20] sm:$0xff] %vm1268_vm0, %v1158_v29  ;;  %v1923_v7 = vadd.f32 %v1922_v36, %v1921_v30  ;;  %v1161_v56 = vadd.f32 %v1160_v37, %v2841_v1  ;;  %v1053_v48 = vadd.f32 %v1920_v25, %v892_v24 }
 0x1c6   : > { %1276 = vst.msk [vmem:[%s2894_s6 + $0x38] sm:$0xff] %vm1268_vm0, %v1169_v32 }
 0x1c7   : > { %1274 = vst.msk [vmem:[%s2894_s6 + $0x28] sm:$0xff] %vm1268_vm0, %v1161_v56  ;;  %v1056_v63 = vadd.f32 %v1923_v7, %v895_v19  ;;  %v919_v7 = vadd.f32 %v2809_v34, %v2823_v10  ;;  %v924_v34 = vadd.f32 %v2811_v40, %v2823_v10 }
 0x1c9   : > { %v1924_v62 = vpop.f32.mrb[56].mxu1  ;;  %v2010_v20 = vpop.f32.mrb[56].mxu0 }
 0x1ca   : > { %v1182_v49 = vadd.f32 %v2010_v20, %v2865_v4  ;;  %v1925_v50 = vpop.f32.mrb[57].mxu1  ;;  %v1173_v3 = vpop.f32.mrb[57].mxu0  ;;  %v903_v4 = vadd.f32 %v2873_v26, %v2823_v10 }
 0x1cb   : > { %v1926_v57 = vadd.f32 %v1925_v50, %v1924_v62  ;;  %v1174_v1 = vadd.f32 %v1173_v3, %v2855_v39  ;;  %v1927_v60 = vpop.f32.mrb[58].mxu1  ;;  %v2011_v12 = vpop.f32.mrb[58].mxu0 }
 0x1cc   : > { %1279 = vst.msk [vmem:[%s2894_s6 + $0x50] sm:$0xff] %vm1268_vm0, %v1182_v49  ;;  %v1185_v22 = vadd.f32 %v2011_v12, %v2867_v5  ;;  %v1928_v47 = vpop.f32.mrb[59].mxu1  ;;  %v1176_v61 = vpop.f32.mrb[59].mxu0 }
 0x1cd   : > { %1277 = vst.msk [vmem:[%s2894_s6 + $0x40] sm:$0xff] %vm1268_vm0, %v1174_v1  ;;  %v1929_v8 = vadd.f32 %v1928_v47, %v1927_v60  ;;  %v1177_v15 = vadd.f32 %v1176_v61, %v2857_v45  ;;  %v1061_v18 = vadd.f32 %v1926_v57, %v900_v16 }
 0x1ce   : > { %1280 = vst.msk [vmem:[%s2894_s6 + $0x58] sm:$0xff] %vm1268_vm0, %v1185_v22  ;;  %v927_v22 = vadd.f32 %v2813_v46, %v2823_v10  ;;  %v932_v46 = vadd.f32 %v2815_v52, %v2823_v10 }
 0x1cf   : > { %1278 = vst.msk [vmem:[%s2894_s6 + $0x48] sm:$0xff] %vm1268_vm0, %v1177_v15  ;;  %v1064_v39 = vadd.f32 %v1929_v8, %v903_v4 }
 0x1d1   : > { %v1930_v54 = vpop.f32.mrb[60].mxu1  ;;  %v2014_v5 = vpop.f32.mrb[60].mxu0 }
 0x1d2   : > { %v1198_v9 = vadd.f32 %v2014_v5, %v2885_v51  ;;  %v1931_v43 = vpop.f32.mrb[61].mxu1  ;;  %v1189_v26 = vpop.f32.mrb[61].mxu0  ;;  %v911_v51 = vadd.f32 %v2883_v42, %v2823_v10  ;;  %v916_v42 = vadd.f32 %v2807_v28, %v2823_v10 }
 0x1d3   : > { %v1932_v11 = vadd.f32 %v1931_v43, %v1930_v54  ;;  %v1190_v45 = vadd.f32 %v1189_v26, %v2875_v27  ;;  %v1933_v31 = vpop.f32.mrb[62].mxu1  ;;  %v2015_v23 = vpop.f32.mrb[62].mxu0 }
 0x1d4   : > { %1283 = vst.msk [vmem:[%s2894_s6 + $0x70] sm:$0xff] %vm1268_vm0, %v1198_v9  ;;  %v1201_v13 = vadd.f32 %v2015_v23, %v2888_v53  ;;  %v1934_v44 = vpop.f32.mrb[63].mxu1  ;;  %v1192_v17 = vpop.f32.mrb[63].mxu0 }
 0x1d5   : > { %1281 = vst.msk [vmem:[%s2894_s6 + $0x60] sm:$0xff] %vm1268_vm0, %v1190_v45  ;;  %v1935_v41 = vadd.f32 %v1934_v44, %v1933_v31  ;;  %v1193_v38 = vadd.f32 %v1192_v17, %v2877_v2  ;;  %v1069_v35 = vadd.f32 %v1932_v11, %v908_v33  ;;  %v935_v31 = vadd.f32 %v2817_v58, %v2823_v10 }
 0x1d6   : > { %1284 = vst.msk [vmem:[%s2894_s6 + $0x78] sm:$0xff] %vm1268_vm0, %v1201_v13  ;;  %v940_v58 = vadd.f32 %v2819_v0, %v2823_v10 }
 0x1d7   : > { %1282 = vst.msk [vmem:[%s2894_s6 + $0x68] sm:$0xff] %vm1268_vm0, %v1193_v38  ;;  %v1072_v27 = vadd.f32 %v1935_v41, %v911_v51 }
 0x1d9   : > { %v1936_v21 = vpop.f32.mrb[64].mxu1  ;;  %v2018_v53 = vpop.f32.mrb[64].mxu0 }
 0x1da   : > { %v1214_v24 = vadd.f32 %v2018_v53, %v1053_v48  ;;  %v1937_v25 = vpop.f32.mrb[65].mxu1  ;;  %v1205_v29 = vpop.f32.mrb[65].mxu0 }
 0x1db   : > { %v1938_v30 = vadd.f32 %v1937_v25, %v1936_v21  ;;  %v1206_v2 = vadd.f32 %v1205_v29, %v2904_v14  ;;  %v1939_v55 = vpop.f32.mrb[66].mxu1  ;;  %v2019_v32 = vpop.f32.mrb[66].mxu0  ;;  %v943_v29 = vadd.f32 %v2821_v6, %v2823_v10 }
 0x1dc   : > { %1287 = vst.msk [vmem:[%s2894_s6 + $0x90] sm:$0xff] %vm1268_vm0, %v1214_v24  ;;  %v1217_v36 = vadd.f32 %v2019_v32, %v1056_v63  ;;  %v1940_v37 = vpop.f32.mrb[67].mxu1  ;;  %v1208_v19 = vpop.f32.mrb[67].mxu0 }
 0x1dd   : > { %1285 = vst.msk [vmem:[%s2894_s6 + $0x80] sm:$0xff] %vm1268_vm0, %v1206_v2  ;;  %v1941_v56 = vadd.f32 %v1940_v37, %v1939_v55  ;;  %v1209_v48 = vadd.f32 %v1208_v19, %v2910_v59  ;;  %v1077_v28 = vadd.f32 %v1938_v30, %v916_v42 }
 0x1de   : > { %1288 = vst.msk [vmem:[%s2894_s6 + $0x98] sm:$0xff] %vm1268_vm0, %v1217_v36 }
 0x1df   : > { %1286 = vst.msk [vmem:[%s2894_s6 + $0x88] sm:$0xff] %vm1268_vm0, %v1209_v48  ;;  %v1080_v14 = vadd.f32 %v1941_v56, %v919_v7 }
 0x1e1   : > { %v1942_v62 = vpop.f32.mrb[68].mxu1  ;;  %v2022_v63 = vpop.f32.mrb[68].mxu0 }
 0x1e2   : > { %v1230_v20 = vadd.f32 %v2022_v63, %v1069_v35  ;;  %v1943_v49 = vpop.f32.mrb[69].mxu1  ;;  %v1221_v50 = vpop.f32.mrb[69].mxu0 }
 0x1e3   : > { %v1944_v3 = vadd.f32 %v1943_v49, %v1942_v62  ;;  %v1222_v16 = vadd.f32 %v1221_v50, %v1061_v18  ;;  %v1945_v59 = vpop.f32.mrb[70].mxu1  ;;  %v2023_v57 = vpop.f32.mrb[70].mxu0 }
 0x1e4   : > { %1291 = vst.msk [vmem:[%s2894_s6 + $0xb0] sm:$0xff] %vm1268_vm0, %v1230_v20  ;;  %v1233_v1 = vadd.f32 %v2023_v57, %v1072_v27  ;;  %v1946_v60 = vpop.f32.mrb[71].mxu1  ;;  %v1224_v12 = vpop.f32.mrb[71].mxu0 }
 0x1e5   : > { %1289 = vst.msk [vmem:[%s2894_s6 + $0xa0] sm:$0xff] %vm1268_vm0, %v1222_v16  ;;  %v1947_v47 = vadd.f32 %v1946_v60, %v1945_v59  ;;  %v1225_v61 = vadd.f32 %v1224_v12, %v1064_v39  ;;  %v1085_v4 = vadd.f32 %v1944_v3, %v924_v34 }
 0x1e6   : > { %1292 = vst.msk [vmem:[%s2894_s6 + $0xb8] sm:$0xff] %vm1268_vm0, %v1233_v1 }
 0x1e7   : > { %1290 = vst.msk [vmem:[%s2894_s6 + $0xa8] sm:$0xff] %vm1268_vm0, %v1225_v61  ;;  %v1088_v40 = vadd.f32 %v1947_v47, %v927_v22 }
 0x1e9   : > { %v1948_v8 = vpop.f32.mrb[72].mxu1  ;;  %v2026_v15 = vpop.f32.mrb[72].mxu0 }
 0x1ea   : > { %v1246_v18 = vadd.f32 %v2026_v15, %v1085_v4  ;;  %v1949_v54 = vpop.f32.mrb[73].mxu1  ;;  %v1237_v5 = vpop.f32.mrb[73].mxu0 }
 0x1eb   : > { %v1950_v9 = vadd.f32 %v1949_v54, %v1948_v8  ;;  %v1238_v43 = vadd.f32 %v1237_v5, %v1077_v28  ;;  %v1951_v39 = vpop.f32.mrb[74].mxu1  ;;  %v2027_v26 = vpop.f32.mrb[74].mxu0 }
 0x1ec   : > { %1295 = vst.msk [vmem:[%s2894_s6 + $0xd0] sm:$0xff] %vm1268_vm0, %v1246_v18  ;;  %v1249_v33 = vadd.f32 %v2027_v26, %v1088_v40  ;;  %v1952_v11 = vpop.f32.mrb[75].mxu1  ;;  %v1240_v45 = vpop.f32.mrb[75].mxu0 }
 0x1ed   : > { %1293 = vst.msk [vmem:[%s2894_s6 + $0xc0] sm:$0xff] %vm1268_vm0, %v1238_v43  ;;  %v1953_v23 = vadd.f32 %v1952_v11, %v1951_v39  ;;  %v1241_v13 = vadd.f32 %v1240_v45, %v1080_v14  ;;  %v1093_v44 = vadd.f32 %v1950_v9, %v932_v46 }
 0x1ee   : > { %1296 = vst.msk [vmem:[%s2894_s6 + $0xd8] sm:$0xff] %vm1268_vm0, %v1249_v33 }
 0x1ef   : > { %1294 = vst.msk [vmem:[%s2894_s6 + $0xc8] sm:$0xff] %vm1268_vm0, %v1241_v13  ;;  %v1096_v52 = vadd.f32 %v1953_v23, %v935_v31 }
 0x1f1   : > { %v1954_v17 = vpop.f32.mrb[76].mxu1  ;;  %v2030_v51 = vpop.f32.mrb[76].mxu0 }
 0x1f2   : > { %v1955_v41 = vpop.f32.mrb[77].mxu1  ;;  %v1253_v38 = vpop.f32.mrb[77].mxu0 }
 0x1f3   : > { %v1956_v35 = vadd.f32 %v1955_v41, %v1954_v17  ;;  %v1254_v27 = vadd.f32 %v1253_v38, %v1093_v44  ;;  %v1957_v21 = vpop.f32.mrb[78].mxu1  ;;  %v2031_v53 = vpop.f32.mrb[78].mxu0 }
 0x1f4   : > { %v1958_v24 = vpop.f32.mrb[79].mxu1  ;;  %v1256_v25 = vpop.f32.mrb[79].mxu0 }
 0x1f5   : > { %v1101_v42 = vadd.f32 %v1956_v35, %v940_v58  ;;  %1297 = vst.msk [vmem:[%s2894_s6 + $0xe0] sm:$0xff] %vm1268_vm0, %v1254_v27  ;;  %v1959_v30 = vadd.f32 %v1958_v24, %v1957_v21  ;;  %v1257_v2 = vadd.f32 %v1256_v25, %v1096_v52  ;;  %1307 = sbr.rel (!%p3169_p6) target bundleno = 564 (0x234), region = 44 }
 0x1f7   : > { %v1262_v55 = vadd.f32 %v2030_v51, %v1101_v42  ;;  %v1104_v32 = vadd.f32 %v1959_v30, %v943_v29  ;;  %1298 = vst.msk [vmem:[%s2894_s6 + $0xe8] sm:$0xff] %vm1268_vm0, %v1257_v2 }
 0x1f9   : > { %1299 = vst.msk [vmem:[%s2894_s6 + $0xf0] sm:$0xff] %vm1268_vm0, %v1262_v55  ;;  %v1265_v0 = vadd.f32 %v2031_v53, %v1104_v32 }
 0x1fb   : > { %1300 = vst.msk [vmem:[%s2894_s6 + $0xf8] sm:$0xff] %vm1268_vm0, %v1265_v0 }
 0x1fc   : > { %s3182_s22 = smov (!%p1310_p7, %s1309_s22), 32 }
 0x1fd   : > { %s1718_s11 = sshll.u32 %s3182_s22, 7 }
 0x1fe   : > { %p1721_p9 = scmp.eq.s32.totalorder %s1718_s11, 0 }
 0x1ff   : > { %s3023_s23 = sshrl.u32 (!%p1721_p9), %s3182_s22, 5 }
 0x200   : > { %1318 = sbr.rel (%p1721_p9) target bundleno = 564 (0x234), region = 48  ;;  %p1722_p12 = scmp.le.s32.totalorder (!%p1721_p9), %s3023_s23, 0 }
 0x207   : > { %1605 = sbr.rel (%p1722_p12) target bundleno = 543 (0x21f), region = 130  ;;  %s3170_s16 = smov (!%p1722_p12), %s3017_s10 }
 0x208   : > { %s3171_s12 = smov (!%p1722_p12), %s2894_s6  ;;  %s3032_s18 = smov (!%p1722_p12), 0  }
 0x209   : > { %s3034_s19 = smov (!%p1722_p12), 0  }
 0x20e LB: >> { %v1442_v6 = vld [vmem:[%s2335_s12] sm:$0xff]  ;;  %v1444_v10 = vld [vmem:[%s2335_s12 + $0x8] sm:$0xff]  ;;  %v1446_v36 = vld [vmem:[%s2335_s12 + $0x10] sm:$0xff]  ;;  %s1506_s25 = sadd.s32 1, %s2339_s18  ;;  %s1436_s19 = sadd.s32 1, %s2343_s19   ;;  %s2343_s19 = sphi %s3034_s19, %s1436_s19   ;;  %s2339_s18 = sphi %s3032_s18, %s3174_s18   ;;  %s2335_s12 = sphi %s3171_s12, %s3173_s12   ;;  %s2331_s16 = sphi %s3170_s16, %s3172_s16  }
 0x20f   : >> { %1443 = vst [vmem:[%s2331_s16] sm:$0xff] %v1442_v6  ;;  %1445 = vst [vmem:[%s2331_s16 + $0x8] sm:$0xff] %v1444_v10  ;;  %v1448_v37 = vld [vmem:[%s2335_s12 + $0x18] sm:$0xff]  ;;  %v1450_v19 = vld [vmem:[%s2335_s12 + $0x20] sm:$0xff]  ;;  %p1507_p0 = scmp.ge.s32.totalorder %s1506_s25, %s3023_s23  ;;  %p1435_p2 = scmp.ge.s32.totalorder %s1436_s19, %s3023_s23 }
 0x210   : >> { %1447 = vst [vmem:[%s2331_s16 + $0x10] sm:$0xff] %v1446_v36  ;;  %v1452_v7 = vld [vmem:[%s2335_s12 + $0x28] sm:$0xff]  ;;  %1449 = vst [vmem:[%s2331_s16 + $0x18] sm:$0xff] %v1448_v37  ;;  %v1454_v56 = vld [vmem:[%s2335_s12 + $0x30] sm:$0xff] }
 0x211   : >> { %1451 = vst [vmem:[%s2331_s16 + $0x20] sm:$0xff] %v1450_v19  ;;  %1453 = vst [vmem:[%s2331_s16 + $0x28] sm:$0xff] %v1452_v7  ;;  %v1456_v48 = vld [vmem:[%s2335_s12 + $0x38] sm:$0xff]  ;;  %v1458_v28 = vld [vmem:[%s2335_s12 + $0x40] sm:$0xff]  ;;  %s3184_s25 = smov (%p1507_p0, %s1506_s25), 0 }
 0x212   : >> { %1455 = vst [vmem:[%s2331_s16 + $0x30] sm:$0xff] %v1454_v56  ;;  %1457 = vst [vmem:[%s2331_s16 + $0x38] sm:$0xff] %v1456_v48  ;;  %v1460_v14 = vld [vmem:[%s2335_s12 + $0x48] sm:$0xff]  ;;  %v1462_v62 = vld [vmem:[%s2335_s12 + $0x50] sm:$0xff]  ;;  %s1723_s27 = sshll.u32 %s3184_s25, 8  ;;  %s3174_s18 = smov %s3184_s25 }
 0x213   : >> { %1459 = vst [vmem:[%s2331_s16 + $0x40] sm:$0xff] %v1458_v28  ;;  %v1464_v63 = vld [vmem:[%s2335_s12 + $0x58] sm:$0xff]  ;;  %1461 = vst [vmem:[%s2331_s16 + $0x48] sm:$0xff] %v1460_v14  ;;  %v1466_v20 = vld [vmem:[%s2335_s12 + $0x60] sm:$0xff]  ;;  %s3090_s26 = scalar_lea.vmem %s2894_s6, %s1723_s27 [#allocation6]   ;;  %s1512_s4 = scalar_lea.vmem %s3017_s10, %s1723_s27  }
 0x214   : >> { %1463 = vst [vmem:[%s2331_s16 + $0x50] sm:$0xff] %v1462_v62  ;;  %1465 = vst [vmem:[%s2331_s16 + $0x58] sm:$0xff] %v1464_v63  ;;  %v1468_v49 = vld [vmem:[%s2335_s12 + $0x68] sm:$0xff]  ;;  %v1470_v50 = vld [vmem:[%s2335_s12 + $0x70] sm:$0xff] }
 0x215   : >> { %1467 = vst [vmem:[%s2331_s16 + $0x60] sm:$0xff] %v1466_v20  ;;  %1469 = vst [vmem:[%s2331_s16 + $0x68] sm:$0xff] %v1468_v49  ;;  %v1472_v34 = vld [vmem:[%s2335_s12 + $0x78] sm:$0xff]  ;;  %v1474_v3 = vld [vmem:[%s2335_s12 + $0x80] sm:$0xff] }
 0x216   : >> { %1471 = vst [vmem:[%s2331_s16 + $0x70] sm:$0xff] %v1470_v50  ;;  %v1476_v16 = vld [vmem:[%s2335_s12 + $0x88] sm:$0xff]  ;;  %1473 = vst [vmem:[%s2331_s16 + $0x78] sm:$0xff] %v1472_v34  ;;  %v1478_v59 = vld [vmem:[%s2335_s12 + $0x90] sm:$0xff] }
 0x217   : >> { %1475 = vst [vmem:[%s2331_s16 + $0x80] sm:$0xff] %v1474_v3  ;;  %1477 = vst [vmem:[%s2331_s16 + $0x88] sm:$0xff] %v1476_v16  ;;  %v1480_v57 = vld [vmem:[%s2335_s12 + $0x98] sm:$0xff]  ;;  %v1482_v1 = vld [vmem:[%s2335_s12 + $0xa0] sm:$0xff] }
 0x218   : >> { %1479 = vst [vmem:[%s2331_s16 + $0x90] sm:$0xff] %v1478_v59  ;;  %1481 = vst [vmem:[%s2331_s16 + $0x98] sm:$0xff] %v1480_v57  ;;  %v1484_v60 = vld [vmem:[%s2335_s12 + $0xa8] sm:$0xff]  ;;  %v1486_v12 = vld [vmem:[%s2335_s12 + $0xb0] sm:$0xff]  ;;  %1438 = sbr.rel (!%p1435_p2) target bundleno = 526 (0x20e), region = 136 }
 0x219   : >> { %1483 = vst [vmem:[%s2331_s16 + $0xa0] sm:$0xff] %v1482_v1  ;;  %v1488_v22 = vld [vmem:[%s2335_s12 + $0xb8] sm:$0xff]  ;;  %1485 = vst [vmem:[%s2331_s16 + $0xa8] sm:$0xff] %v1484_v60  ;;  %v1490_v47 = vld [vmem:[%s2335_s12 + $0xc0] sm:$0xff] }
 0x21a   : >> { %1487 = vst [vmem:[%s2331_s16 + $0xb0] sm:$0xff] %v1486_v12  ;;  %1489 = vst [vmem:[%s2331_s16 + $0xb8] sm:$0xff] %v1488_v22  ;;  %v1492_v61 = vld [vmem:[%s2335_s12 + $0xc8] sm:$0xff]  ;;  %v1494_v4 = vld [vmem:[%s2335_s12 + $0xd0] sm:$0xff] }
 0x21b   : >> { %1491 = vst [vmem:[%s2331_s16 + $0xc0] sm:$0xff] %v1490_v47  ;;  %1493 = vst [vmem:[%s2331_s16 + $0xc8] sm:$0xff] %v1492_v61  ;;  %v1496_v40 = vld [vmem:[%s2335_s12 + $0xd8] sm:$0xff]  ;;  %v1498_v8 = vld [vmem:[%s2335_s12 + $0xe0] sm:$0xff] }
 0x21c   : >> { %1495 = vst [vmem:[%s2331_s16 + $0xd0] sm:$0xff] %v1494_v4  ;;  %v1500_v15 = vld [vmem:[%s2335_s12 + $0xe8] sm:$0xff]  ;;  %1497 = vst [vmem:[%s2331_s16 + $0xd8] sm:$0xff] %v1496_v40  ;;  %v1502_v18 = vld [vmem:[%s2335_s12 + $0xf0] sm:$0xff] }
 0x21d   : >> { %1499 = vst [vmem:[%s2331_s16 + $0xe0] sm:$0xff] %v1498_v8  ;;  %1501 = vst [vmem:[%s2331_s16 + $0xe8] sm:$0xff] %v1500_v15  ;;  %v1504_v54 = vld [vmem:[%s2335_s12 + $0xf8] sm:$0xff]  ;;  %s3173_s12 = smov %s3090_s26 }
 0x21e   : >> { %1503 = vst [vmem:[%s2331_s16 + $0xf0] sm:$0xff] %v1502_v18  ;;  %1505 = vst [vmem:[%s2331_s16 + $0xf8] sm:$0xff] %v1504_v54  ;;  %s3172_s16 = smov %s1512_s4 }
 0x21f PF: > { %s3131_s5 = sand.u32 31, %s3182_s22   ;;  %s1734_s24 = sshll.u32 %s3023_s23, 8 }
 0x220   : > { %s1517_s28 = scalar_lea.vmem %s2894_s6, %s1734_s24 [#allocation6]   ;;  %s1519_s29 = scalar_lea.vmem %s3017_s10, %s1734_s24  }
 0x221   : > { %p1728_p5 = scmp.le.s32.totalorder %s3131_s5, 0 }
 0x222   : > { %s2345_s30 = smov (!%p1728_p5), %s1519_s29   ;;  %s2349_s7 = smov (!%p1728_p5), %s1517_s28  }
 0x223   : > { %1619 = sbr.rel (%p1728_p5) target bundleno = 564 (0x234), region = 141  ;;  %s2353_s21 = smov (!%p1728_p5), 0  }
 0x224   : > { %s2357_s8 = smov (!%p1728_p5), 0  }
 0x22a LB: >> { %v1529_v5 = vld [vmem:[%s2351_s7] sm:$0xff]  ;;  %s1531_s22 = sadd.s32 1, %s2355_s21  ;;  %s1523_s8 = sadd.s32 1, %s2359_s8   ;;  %s2359_s8 = sphi %s2357_s8, %s1523_s8   ;;  %s2355_s21 = sphi %s2353_s21, %s2354_s21   ;;  %s2351_s7 = sphi %s2349_s7, %s1536_s7   ;;  %s2347_s30 = sphi %s2345_s30, %s1537_s30  }
 0x22b   : >> { %1530 = vst [vmem:[%s2347_s30] sm:$0xff] %v1529_v5  ;;  %p1532_p8 = scmp.ge.s32.totalorder %s1531_s22, %s3131_s5  ;;  %p1522_p10 = scmp.ge.s32.totalorder %s1523_s8, %s3131_s5 }
 0x22d   : >> { %s3186_s22 = smov (%p1532_p8, %s1531_s22), 0  ;;  %1525 = sbr.rel (!%p1522_p10) target bundleno = 554 (0x22a), region = 147 }
 0x22e   : >> { %s1729_s6 = sshll.u32 %s3186_s22, 3  ;;  %s2354_s21 = smov %s3186_s22  }
 0x22f   : >> { %s1536_s7 = scalar_lea.vmem %s1517_s28, %s1729_s6 [#allocation6]   ;;  %s1537_s30 = scalar_lea.vmem %s1519_s29, %s1729_s6  }
 0x234 PF: > { %p14_p13 = scmp.ge.s32.totalorder %s2407_s17, 6   ;;  %s3175_s12 = smov %s2319_s13 }
 0x235   : > { %s3176_s13 = smov %s2323_s14  ;;  %s3177_s14 = smov %s2417_s20 }
 0x236   : > { %s3178_s15 = smov %s2407_s17  ;;  %16 = sbr.rel (!%p14_p13) target bundleno = 4 (0x4), region = 158 }
 0x23d   :  { %1553 = vsyncpa [#allocation3], 1 }
 0x23e   :  { %1555 = vsyncpa [#allocation3 + $0x1], 1 }
 0x23f   :  { %1556 = vsyncpa [#allocation5], 1 }

</bundles_post_ra>
